<compile_context>
chip_gen: v6e
topology: v6e:2x2x1
jax: 0.10.0
libtpu: 0.0.40
codegen_flags: <defaults>
</compile_context>

<pallas_src>
import numpy as np
import jax
import jax.numpy as jnp
from jax import lax
from jax.experimental import pallas as pl
from jax.experimental.pallas import tpu as pltpu

BN_EPS = 1e-5
LEAKY_SLOPE = 0.01              # nn.LeakyReLU default negative_slope
VMEM_LIMIT = 32 * 1024 * 1024   # explicit scoped-VMEM limit (>= v5e default, <= v6e/v7x)


# ----------------------------- Pallas kernels -----------------------------

def _conv_relu_pool_bn_kernel(p_ref, w_ref, b_ref, scale_ref, shift_ref, o_ref):
    """Fused Conv3d(3^3, valid) + bias + ReLU + MaxPool3d(2) + BatchNorm3d (inference).

    p_ref:          (1, 2, 4, K, Mp) bf16 -- im2col patches for one (sample, depth-pair);
                    axis 1 = output depth within the pooling pair, axis 2 = (h,w) parity
                    of the 2x2 spatial pooling window, K = 27*Cin, Mp = Hp*Wp (lane axis).
    w_ref:          (Cout, K) bf16
    b/scale/shift:  (Cout, 1) f32
    o_ref:          (1, 1, Cout, Mp) f32 -- pooled + BN'd activations, spatial lane-dense.
    """
    w = w_ref[...]
    b = b_ref[...]
    m = None
    for od in range(2):              # 2 output depths of the 2x2x2 pooling window
        for q in range(4):           # 4 (h, w) positions of the window
            y = jnp.dot(w, p_ref[0, od, q],
                        preferred_element_type=jnp.float32) + b   # conv + bias (MXU)
            y = jnp.maximum(y, 0.0)                               # ReLU
            m = y if m is None else jnp.maximum(m, y)             # MaxPool3d(2,2,2)
    o_ref[0, 0] = m * scale_ref[...] + shift_ref[...]             # BatchNorm3d (eval)


def _head_kernel(x_ref, w1_ref, b1_ref, w2_ref, b2_ref, o_ref, h_acc):
    """fc1 (K-tiled reduction with a VMEM accumulator) + LeakyReLU + fc2.
    Weights stay in PyTorch (out_features, in_features) layout; the contraction is
    expressed with dot_general, so no wrapper-side transpose copies."""
    k = pl.program_id(0)

    @pl.when(k == 0)
    def _():
        h_acc[...] = jnp.zeros_like(h_acc)

    h_acc[...] += lax.dot_general(
        x_ref[...], w1_ref[...], (((1,), (1,)), ((), ())),
        preferred_element_type=jnp.float32)

    @pl.when(k == pl.num_programs(0) - 1)
    def _():
        h = h_acc[...] + b1_ref[...]
        h = jnp.where(h >= 0, h, LEAKY_SLOPE * h)          # LeakyReLU
        # Dropout(p=dr) is the identity at inference time.
        # TODO(synk): training-mode stochastic dropout masking not implemented.
        o_ref[...] = lax.dot_general(
            h, w2_ref[...], (((1,), (1,)), ((), ())),
            preferred_element_type=jnp.float32) + b2_ref[...]


# ------------------------------- glue + wrappers -------------------------------

def _pool_parity_patches(x, Dp, Hp, Wp):
    """x: (N, D, H, W, Cin) -> patches (N, 2*Dp, 4, 27*Cin, Hp*Wp) in bf16.

    patches[n, od, 2*qh+qw, (kd*9+kh*3+kw)*Cin+c, jh*Wp+jw]
        = x[n, od+kd, 2*jh+qh+kh, 2*jw+qw+kw, c]
    i.e. the im2col column of conv-output position (od, 2*jh+qh, 2*jw+qw), grouped so the
    4 (h,w) members of each 2x2 pooling window sit on their own axis and the pooled
    spatial index is last (lane-dense).  Positions dropped by MaxPool floor are skipped.
    # TODO(synk): patch extraction is still XLA glue (27x activation blow-up in HBM);
    # in-kernel extraction from an NDHWC VMEM slab would cut it further but is not done.
    """
    N = x.shape[0]
    Cin = x.shape[-1]
    cols = []
    for kd in range(3):
        for kh in range(3):
            for kw in range(3):
                cols.append(x[:, kd:kd + 2 * Dp, kh:kh + 2 * Hp, kw:kw + 2 * Wp, :])
    p = jnp.stack(cols, axis=-2)                        # (N, 2Dp, 2Hp, 2Wp, 27, Cin)
    p = p.reshape(N, 2 * Dp, Hp, 2, Wp, 2, 27 * Cin)    # split (h, w) into (index, parity)
    p = p.transpose(0, 1, 3, 5, 6, 2, 4)                # (N, 2Dp, qh, qw, K, jh, jw)
    return p.reshape(N, 2 * Dp, 4, 27 * Cin, Hp * Wp).astype(jnp.bfloat16)


def conv_block_pallas(x, w, b, gamma, beta, mean, var):
    """One conv block on NDHWC input; returns NDHWC output (N, Dp, Hp, Wp, Cout)."""
    N, D, H, W, Cin = x.shape
    Cout = w.shape[0]
    Do, Ho, Wo = D - 2, H - 2, W - 2
    Dp, Hp, Wp = Do // 2, Ho // 2, Wo // 2     # MaxPool3d floor behavior
    K, Mp = 27 * Cin, Hp * Wp

    p = _pool_parity_patches(x, Dp, Hp, Wp)
    # PyTorch Conv3d weight (Cout, Cin, kd, kh, kw) -> (Cout, kd, kh, kw, Cin) -> (Cout, 27*Cin)
    w2d = jnp.transpose(w, (0, 2, 3, 4, 1)).reshape(Cout, K).astype(jnp.bfloat16)
    scale = gamma / jnp.sqrt(var + BN_EPS)
    shift = beta - mean * scale

    cost = pl.CostEstimate(
        flops=2 * N * 2 * Dp * 4 * Mp * K * Cout,
        transcendentals=0,
        bytes_accessed=(N * 2 * Dp * 4 * K * Mp * 2 + Cout * K * 2
                        + N * Dp * Cout * Mp * 4 + 3 * Cout * 4))

    out = pl.pallas_call(
        _conv_relu_pool_bn_kernel,
        out_shape=jax.ShapeDtypeStruct((N, Dp, Cout, Mp), jnp.float32),
        grid=(N, Dp),
        in_specs=[
            pl.BlockSpec((1, 2, 4, K, Mp), lambda n, d: (n, d, 0, 0, 0)),
            pl.BlockSpec((Cout, K), lambda n, d: (0, 0)),
            pl.BlockSpec((Cout, 1), lambda n, d: (0, 0)),
            pl.BlockSpec((Cout, 1), lambda n, d: (0, 0)),
            pl.BlockSpec((Cout, 1), lambda n, d: (0, 0)),
        ],
        out_specs=pl.BlockSpec((1, 1, Cout, Mp), lambda n, d: (n, d, 0, 0)),
        compiler_params=pltpu.CompilerParams(
            dimension_semantics=("parallel", "parallel"),
            vmem_limit_bytes=VMEM_LIMIT),
        cost_estimate=cost,
    )(p, w2d, b[:, None], scale[:, None], shift[:, None])

    # (N, Dp, Cout, Hp*Wp) -> NDHWC for the next block / the flatten
    return out.reshape(N, Dp, Cout, Hp, Wp).transpose(0, 1, 3, 4, 2)


def _choose_k_tile(K, cap=2048):
    if K <= cap:
        return K
    for t in range(cap, 0, -1):
        if K % t == 0:
            return t
    return K


def head_pallas(feat, w1, b1, w2, b2):
    N, K = feat.shape
    H1, O = w1.shape[0], w2.shape[0]
    Kt = _choose_k_tile(K)
    cost = pl.CostEstimate(
        flops=2 * N * K * H1 + 2 * N * H1 * O,
        transcendentals=0,
        bytes_accessed=(N * K + H1 * K + H1 + O * H1 + O + N * O) * 4)
    return pl.pallas_call(
        _head_kernel,
        out_shape=jax.ShapeDtypeStruct((N, O), jnp.float32),
        grid=(K // Kt,),
        in_specs=[
            pl.BlockSpec((N, Kt), lambda k: (0, k)),
            pl.BlockSpec((H1, Kt), lambda k: (0, k)),
            pl.BlockSpec((1, H1), lambda k: (0, 0)),
            pl.BlockSpec((O, H1), lambda k: (0, 0)),
            pl.BlockSpec((1, O), lambda k: (0, 0)),
        ],
        out_specs=pl.BlockSpec((N, O), lambda k: (0, 0)),
        scratch_shapes=[pltpu.VMEM((N, H1), jnp.float32)],
        compiler_params=pltpu.CompilerParams(
            dimension_semantics=("arbitrary",),
            vmem_limit_bytes=VMEM_LIMIT),
        cost_estimate=cost,
    )(feat, w1, b1[None, :], w2, b2[None, :])


@jax.jit
def cnn3d3_forward(x_ncdhw, params):
    # NCDHW (PyTorch) -> NDHWC (internal)
    x = jnp.transpose(x_ncdhw, (0, 2, 3, 4, 1))
    for lp in params["conv"]:
        x = conv_block_pallas(x, lp["w"], lp["b"], lp["gamma"], lp["beta"],
                              lp["mean"], lp["var"])
    # flatten exactly like x.view(N, -1) on an NCDHW tensor
    N = x.shape[0]
    feat = jnp.transpose(x, (0, 4, 1, 2, 3)).reshape(N, -1)
    return head_pallas(feat, params["fc1_w"], params["fc1_b"],
                       params["fc2_w"], params["fc2_b"])


# ------------------------------- parameters -------------------------------

def init_params(key, nf, fc1_in):
    chans = [1, nf * 2, nf * 4, nf * 8]
    conv_layers = []
    for i in range(3):
        key, k1, k2, k3, k4, k5, k6 = jax.random.split(key, 7)
        cin, cout = chans[i], chans[i + 1]
        fan_in = cin * 27
        conv_layers.append(dict(
            w=jax.random.normal(k1, (cout, cin, 3, 3, 3), jnp.float32) / np.sqrt(fan_in),
            b=0.1 * jax.random.normal(k2, (cout,), jnp.float32),
            gamma=1.0 + 0.1 * jax.random.normal(k3, (cout,), jnp.float32),
            beta=0.1 * jax.random.normal(k4, (cout,), jnp.float32),
            mean=0.1 * jax.random.normal(k5, (cout,), jnp.float32),
            var=1.0 + 0.1 * jax.random.uniform(k6, (cout,), jnp.float32),
        ))
    key, k1, k2, k3, k4 = jax.random.split(key, 5)
    return dict(
        conv=conv_layers,
        fc1_w=jax.random.normal(k1, (128, fc1_in), jnp.float32) / np.sqrt(fc1_in),
        fc1_b=0.1 * jax.random.normal(k2, (128,), jnp.float32),
        fc2_w=jax.random.normal(k3, (3, 128), jnp.float32) / np.sqrt(128),
        fc2_b=0.1 * jax.random.normal(k4, (3,), jnp.float32),
    )


# ------------------------------- pure-JAX reference -------------------------------

def reference_forward(x_ncdhw, params, conv_dtype=jnp.float32):
    """XLA reference.  conv_dtype=bfloat16 matches the kernel's MXU input precision
    (f32 accumulation); conv_dtype=float32 is the exact PyTorch-f32 semantics."""
    x = x_ncdhw
    for lp in params["conv"]:
        x = lax.conv_general_dilated(
            x.astype(conv_dtype), lp["w"].astype(conv_dtype),
            window_strides=(1, 1, 1), padding="VALID",
            dimension_numbers=("NCDHW", "OIDHW", "NCDHW"),
            preferred_element_type=jnp.float32,
            precision=lax.Precision.HIGHEST)
        x = x + lp["b"][None, :, None, None, None]
        x = jnp.maximum(x, 0.0)
        x = lax.reduce_window(x, -jnp.inf, lax.max,
                              (1, 1, 2, 2, 2), (1, 1, 2, 2, 2), "VALID")
        scale = lp["gamma"] / jnp.sqrt(lp["var"] + BN_EPS)
        shift = lp["beta"] - lp["mean"] * scale
        x = x * scale[None, :, None, None, None] + shift[None, :, None, None, None]
    x = x.reshape(x.shape[0], -1)
    h = x @ params["fc1_w"].T + params["fc1_b"]
    h = jnp.where(h >= 0, h, LEAKY_SLOPE * h)
    return h @ params["fc2_w"].T + params["fc2_b"]


# ------------------------------------ main ------------------------------------

if __name__ == "__main__":
    nf = 2                       # channels: 4 -> 8 -> 16
    N, D, H, W = 2, 30, 30, 30   # small input (original model used ~100 x ~190 x ~190)
    # With 30^3 input the conv/pool stack yields (nf*8, 2, 2, 2) features,
    # so fc1 in-features = nf*8*2*2*2 (the module's nf*8*10*22*22 scaled to this input).
    fc1_in = (nf * 8) * 2 * 2 * 2

    key = jax.random.PRNGKey(0)
    key, kx = jax.random.split(key)
    x = jax.random.normal(kx, (N, 1, D, H, W), jnp.float32)
    params = init_params(key, nf, fc1_in)

    out = jax.block_until_ready(cnn3d3_forward(x, params))
    assert out.shape == (N, 3), out.shape

    # (a) strict check vs a reference using the same bf16 conv-GEMM input precision
    ref_mx = reference_forward(x, params, conv_dtype=jnp.bfloat16)
    err_mx = float(jnp.max(jnp.abs(out - ref_mx)))
    assert err_mx < 2e-2, f"mismatch vs bf16-matched reference: max abs err {err_mx}"

    # (b) sanity check vs the full-f32 reference (difference = bf16 rounding of conv inputs)
    ref_f32 = reference_forward(x, params, conv_dtype=jnp.float32)
    err_f32 = float(jnp.max(jnp.abs(out - ref_f32)))
    assert err_f32 < 1e-1, f"mismatch vs f32 reference: max abs err {err_f32}"

    print("KERNEL_OK")
</pallas_src>

<mosaic_0001>
module attributes {stable_mosaic.version = 11 : i64} {
  func.func @_conv_relu_pool_bn_kernel(%arg0: i32, %arg1: i32, %arg2: memref<1x2x4x27x196xbf16, #tpu.memory_space<vmem>>, %arg3: memref<4x27xbf16, #tpu.memory_space<vmem>>, %arg4: memref<4x1xf32, #tpu.memory_space<vmem>>, %arg5: memref<4x1xf32, #tpu.memory_space<vmem>>, %arg6: memref<4x1xf32, #tpu.memory_space<vmem>>, %arg7: memref<1x1x4x196xf32, #tpu.memory_space<vmem>>) attributes {dimension_semantics = [#tpu.dimension_semantics<parallel>, #tpu.dimension_semantics<parallel>], iteration_bounds = array<i64: 2, 14>, scalar_prefetch = 0 : i64, scratch_operands = 0 : i64, tpu.core_type = #tpu.core_type<tc>, window_params = [{transform_indices = @transform_0, window_bounds = array<i64: 1, 2, 4, 27, 196>}, {pipeline_mode = #tpu.pipeline_mode<synchronous>, transform_indices = @transform_1, window_bounds = array<i64: 4, 27>}, {pipeline_mode = #tpu.pipeline_mode<synchronous>, transform_indices = @transform_2, window_bounds = array<i64: 4, 1>}, {pipeline_mode = #tpu.pipeline_mode<synchronous>, transform_indices = @transform_3, window_bounds = array<i64: 4, 1>}, {pipeline_mode = #tpu.pipeline_mode<synchronous>, transform_indices = @transform_4, window_bounds = array<i64: 4, 1>}, {transform_indices = @transform_5, window_bounds = array<i64: 1, 1, 4, 196>}]} {
    %c0 = arith.constant 0 : index
    %c0_0 = arith.constant 0 : index
    %0 = vector.load %arg3[%c0, %c0_0] : memref<4x27xbf16, #tpu.memory_space<vmem>>, vector<4x27xbf16>
    %c0_1 = arith.constant 0 : index
    %c0_2 = arith.constant 0 : index
    %1 = vector.load %arg4[%c0_1, %c0_2] : memref<4x1xf32, #tpu.memory_space<vmem>>, vector<4x1xf32>
    %c0_3 = arith.constant 0 : index
    %c0_4 = arith.constant 0 : index
    %c0_5 = arith.constant 0 : index
    %c0_6 = arith.constant 0 : index
    %c0_7 = arith.constant 0 : index
    %2 = vector.load %arg2[%c0_3, %c0_4, %c0_5, %c0_6, %c0_7] : memref<1x2x4x27x196xbf16, #tpu.memory_space<vmem>>, vector<1x1x1x27x196xbf16>
    %3 = vector.shape_cast %2 : vector<1x1x1x27x196xbf16> to vector<27x196xbf16>
    %cst = arith.constant dense<0.000000e+00> : vector<4x196xf32>
    %4 = tpu.matmul %0, %3, %cst {dimension_numbers = #tpu.dot_dimension_numbers<[1], [0], [0], [1], [0, 0, 1, 1], [], []>} : vector<4x27xbf16>, vector<27x196xbf16>, vector<4x196xf32> -> vector<4x196xf32>
    %5 = vector.broadcast %1 : vector<4x1xf32> to vector<4x196xf32>
    %6 = arith.addf %4, %5 : vector<4x196xf32>
    %cst_8 = arith.constant 0.000000e+00 : f32
    %7 = vector.broadcast %cst_8 : f32 to vector<4x196xf32>
    %8 = arith.maximumf %6, %7 : vector<4x196xf32>
    %c0_9 = arith.constant 0 : index
    %c0_10 = arith.constant 0 : index
    %c1 = arith.constant 1 : index
    %c0_11 = arith.constant 0 : index
    %c0_12 = arith.constant 0 : index
    %9 = vector.load %arg2[%c0_9, %c0_10, %c1, %c0_11, %c0_12] : memref<1x2x4x27x196xbf16, #tpu.memory_space<vmem>>, vector<1x1x1x27x196xbf16>
    %10 = vector.shape_cast %9 : vector<1x1x1x27x196xbf16> to vector<27x196xbf16>
    %cst_13 = arith.constant dense<0.000000e+00> : vector<4x196xf32>
    %11 = tpu.matmul %0, %10, %cst_13 {dimension_numbers = #tpu.dot_dimension_numbers<[1], [0], [0], [1], [0, 0, 1, 1], [], []>} : vector<4x27xbf16>, vector<27x196xbf16>, vector<4x196xf32> -> vector<4x196xf32>
    %12 = vector.broadcast %1 : vector<4x1xf32> to vector<4x196xf32>
    %13 = arith.addf %11, %12 : vector<4x196xf32>
    %cst_14 = arith.constant 0.000000e+00 : f32
    %14 = vector.broadcast %cst_14 : f32 to vector<4x196xf32>
    %15 = arith.maximumf %13, %14 : vector<4x196xf32>
    %16 = arith.maximumf %8, %15 : vector<4x196xf32>
    %c0_15 = arith.constant 0 : index
    %c0_16 = arith.constant 0 : index
    %c2 = arith.constant 2 : index
    %c0_17 = arith.constant 0 : index
    %c0_18 = arith.constant 0 : index
    %17 = vector.load %arg2[%c0_15, %c0_16, %c2, %c0_17, %c0_18] : memref<1x2x4x27x196xbf16, #tpu.memory_space<vmem>>, vector<1x1x1x27x196xbf16>
    %18 = vector.shape_cast %17 : vector<1x1x1x27x196xbf16> to vector<27x196xbf16>
    %cst_19 = arith.constant dense<0.000000e+00> : vector<4x196xf32>
    %19 = tpu.matmul %0, %18, %cst_19 {dimension_numbers = #tpu.dot_dimension_numbers<[1], [0], [0], [1], [0, 0, 1, 1], [], []>} : vector<4x27xbf16>, vector<27x196xbf16>, vector<4x196xf32> -> vector<4x196xf32>
    %20 = vector.broadcast %1 : vector<4x1xf32> to vector<4x196xf32>
    %21 = arith.addf %19, %20 : vector<4x196xf32>
    %cst_20 = arith.constant 0.000000e+00 : f32
    %22 = vector.broadcast %cst_20 : f32 to vector<4x196xf32>
    %23 = arith.maximumf %21, %22 : vector<4x196xf32>
    %24 = arith.maximumf %16, %23 : vector<4x196xf32>
    %c0_21 = arith.constant 0 : index
    %c0_22 = arith.constant 0 : index
    %c3 = arith.constant 3 : index
    %c0_23 = arith.constant 0 : index
    %c0_24 = arith.constant 0 : index
    %25 = vector.load %arg2[%c0_21, %c0_22, %c3, %c0_23, %c0_24] : memref<1x2x4x27x196xbf16, #tpu.memory_space<vmem>>, vector<1x1x1x27x196xbf16>
    %26 = vector.shape_cast %25 : vector<1x1x1x27x196xbf16> to vector<27x196xbf16>
    %cst_25 = arith.constant dense<0.000000e+00> : vector<4x196xf32>
    %27 = tpu.matmul %0, %26, %cst_25 {dimension_numbers = #tpu.dot_dimension_numbers<[1], [0], [0], [1], [0, 0, 1, 1], [], []>} : vector<4x27xbf16>, vector<27x196xbf16>, vector<4x196xf32> -> vector<4x196xf32>
    %28 = vector.broadcast %1 : vector<4x1xf32> to vector<4x196xf32>
    %29 = arith.addf %27, %28 : vector<4x196xf32>
    %cst_26 = arith.constant 0.000000e+00 : f32
    %30 = vector.broadcast %cst_26 : f32 to vector<4x196xf32>
    %31 = arith.maximumf %29, %30 : vector<4x196xf32>
    %32 = arith.maximumf %24, %31 : vector<4x196xf32>
    %c0_27 = arith.constant 0 : index
    %c1_28 = arith.constant 1 : index
    %c0_29 = arith.constant 0 : index
    %c0_30 = arith.constant 0 : index
    %c0_31 = arith.constant 0 : index
    %33 = vector.load %arg2[%c0_27, %c1_28, %c0_29, %c0_30, %c0_31] : memref<1x2x4x27x196xbf16, #tpu.memory_space<vmem>>, vector<1x1x1x27x196xbf16>
    %34 = vector.shape_cast %33 : vector<1x1x1x27x196xbf16> to vector<27x196xbf16>
    %cst_32 = arith.constant dense<0.000000e+00> : vector<4x196xf32>
    %35 = tpu.matmul %0, %34, %cst_32 {dimension_numbers = #tpu.dot_dimension_numbers<[1], [0], [0], [1], [0, 0, 1, 1], [], []>} : vector<4x27xbf16>, vector<27x196xbf16>, vector<4x196xf32> -> vector<4x196xf32>
    %36 = vector.broadcast %1 : vector<4x1xf32> to vector<4x196xf32>
    %37 = arith.addf %35, %36 : vector<4x196xf32>
    %cst_33 = arith.constant 0.000000e+00 : f32
    %38 = vector.broadcast %cst_33 : f32 to vector<4x196xf32>
    %39 = arith.maximumf %37, %38 : vector<4x196xf32>
    %40 = arith.maximumf %32, %39 : vector<4x196xf32>
    %c0_34 = arith.constant 0 : index
    %c1_35 = arith.constant 1 : index
    %c1_36 = arith.constant 1 : index
    %c0_37 = arith.constant 0 : index
    %c0_38 = arith.constant 0 : index
    %41 = vector.load %arg2[%c0_34, %c1_35, %c1_36, %c0_37, %c0_38] : memref<1x2x4x27x196xbf16, #tpu.memory_space<vmem>>, vector<1x1x1x27x196xbf16>
    %42 = vector.shape_cast %41 : vector<1x1x1x27x196xbf16> to vector<27x196xbf16>
    %cst_39 = arith.constant dense<0.000000e+00> : vector<4x196xf32>
    %43 = tpu.matmul %0, %42, %cst_39 {dimension_numbers = #tpu.dot_dimension_numbers<[1], [0], [0], [1], [0, 0, 1, 1], [], []>} : vector<4x27xbf16>, vector<27x196xbf16>, vector<4x196xf32> -> vector<4x196xf32>
    %44 = vector.broadcast %1 : vector<4x1xf32> to vector<4x196xf32>
    %45 = arith.addf %43, %44 : vector<4x196xf32>
    %cst_40 = arith.constant 0.000000e+00 : f32
    %46 = vector.broadcast %cst_40 : f32 to vector<4x196xf32>
    %47 = arith.maximumf %45, %46 : vector<4x196xf32>
    %48 = arith.maximumf %40, %47 : vector<4x196xf32>
    %c0_41 = arith.constant 0 : index
    %c1_42 = arith.constant 1 : index
    %c2_43 = arith.constant 2 : index
    %c0_44 = arith.constant 0 : index
    %c0_45 = arith.constant 0 : index
    %49 = vector.load %arg2[%c0_41, %c1_42, %c2_43, %c0_44, %c0_45] : memref<1x2x4x27x196xbf16, #tpu.memory_space<vmem>>, vector<1x1x1x27x196xbf16>
    %50 = vector.shape_cast %49 : vector<1x1x1x27x196xbf16> to vector<27x196xbf16>
    %cst_46 = arith.constant dense<0.000000e+00> : vector<4x196xf32>
    %51 = tpu.matmul %0, %50, %cst_46 {dimension_numbers = #tpu.dot_dimension_numbers<[1], [0], [0], [1], [0, 0, 1, 1], [], []>} : vector<4x27xbf16>, vector<27x196xbf16>, vector<4x196xf32> -> vector<4x196xf32>
    %52 = vector.broadcast %1 : vector<4x1xf32> to vector<4x196xf32>
    %53 = arith.addf %51, %52 : vector<4x196xf32>
    %cst_47 = arith.constant 0.000000e+00 : f32
    %54 = vector.broadcast %cst_47 : f32 to vector<4x196xf32>
    %55 = arith.maximumf %53, %54 : vector<4x196xf32>
    %56 = arith.maximumf %48, %55 : vector<4x196xf32>
    %c0_48 = arith.constant 0 : index
    %c1_49 = arith.constant 1 : index
    %c3_50 = arith.constant 3 : index
    %c0_51 = arith.constant 0 : index
    %c0_52 = arith.constant 0 : index
    %57 = vector.load %arg2[%c0_48, %c1_49, %c3_50, %c0_51, %c0_52] : memref<1x2x4x27x196xbf16, #tpu.memory_space<vmem>>, vector<1x1x1x27x196xbf16>
    %58 = vector.shape_cast %57 : vector<1x1x1x27x196xbf16> to vector<27x196xbf16>
    %cst_53 = arith.constant dense<0.000000e+00> : vector<4x196xf32>
    %59 = tpu.matmul %0, %58, %cst_53 {dimension_numbers = #tpu.dot_dimension_numbers<[1], [0], [0], [1], [0, 0, 1, 1], [], []>} : vector<4x27xbf16>, vector<27x196xbf16>, vector<4x196xf32> -> vector<4x196xf32>
    %60 = vector.broadcast %1 : vector<4x1xf32> to vector<4x196xf32>
    %61 = arith.addf %59, %60 : vector<4x196xf32>
    %cst_54 = arith.constant 0.000000e+00 : f32
    %62 = vector.broadcast %cst_54 : f32 to vector<4x196xf32>
    %63 = arith.maximumf %61, %62 : vector<4x196xf32>
    %64 = arith.maximumf %56, %63 : vector<4x196xf32>
    %c0_55 = arith.constant 0 : index
    %c0_56 = arith.constant 0 : index
    %65 = vector.load %arg5[%c0_55, %c0_56] : memref<4x1xf32, #tpu.memory_space<vmem>>, vector<4x1xf32>
    %66 = vector.broadcast %65 : vector<4x1xf32> to vector<4x196xf32>
    %67 = arith.mulf %64, %66 : vector<4x196xf32>
    %c0_57 = arith.constant 0 : index
    %c0_58 = arith.constant 0 : index
    %68 = vector.load %arg6[%c0_57, %c0_58] : memref<4x1xf32, #tpu.memory_space<vmem>>, vector<4x1xf32>
    %69 = vector.broadcast %68 : vector<4x1xf32> to vector<4x196xf32>
    %70 = arith.addf %67, %69 : vector<4x196xf32>
    %c0_59 = arith.constant 0 : index
    %c0_60 = arith.constant 0 : index
    %c0_61 = arith.constant 0 : index
    %c0_62 = arith.constant 0 : index
    %71 = vector.load %arg7[%c0_59, %c0_60, %c0_61, %c0_62] : memref<1x1x4x196xf32, #tpu.memory_space<vmem>>, vector<1x1x4x196xf32>
    %72 = vector.shape_cast %71 : vector<1x1x4x196xf32> to vector<4x196xf32>
    %73 = vector.shape_cast %70 : vector<4x196xf32> to vector<1x1x4x196xf32>
    tpu.vector_store %arg7[%c0_59, %c0_60, %c0_61, %c0_62], %73 {strides = array<i32>} : memref<1x1x4x196xf32, #tpu.memory_space<vmem>>, vector<1x1x4x196xf32>,
    return
  }
  func.func @transform_0(%arg0: i32, %arg1: i32) -> (i32, i32, i32, i32, i32) {
    %c0_i32 = arith.constant 0 : i32
    %c0_i32_0 = arith.constant 0 : i32
    %c0_i32_1 = arith.constant 0 : i32
    %c0_i32_2 = arith.constant 0 : i32
    return %arg0, %arg1, %c0_i32, %c0_i32_0, %c0_i32_1 : i32, i32, i32, i32, i32
  }
  func.func @transform_1(%arg0: i32, %arg1: i32) -> (i32, i32) {
    %c0_i32 = arith.constant 0 : i32
    %c0_i32_0 = arith.constant 0 : i32
    %c0_i32_1 = arith.constant 0 : i32
    return %c0_i32, %c0_i32_0 : i32, i32
  }
  func.func @transform_2(%arg0: i32, %arg1: i32) -> (i32, i32) {
    %c0_i32 = arith.constant 0 : i32
    %c0_i32_0 = arith.constant 0 : i32
    %c0_i32_1 = arith.constant 0 : i32
    return %c0_i32, %c0_i32_0 : i32, i32
  }
  func.func @transform_3(%arg0: i32, %arg1: i32) -> (i32, i32) {
    %c0_i32 = arith.constant 0 : i32
    %c0_i32_0 = arith.constant 0 : i32
    %c0_i32_1 = arith.constant 0 : i32
    return %c0_i32, %c0_i32_0 : i32, i32
  }
  func.func @transform_4(%arg0: i32, %arg1: i32) -> (i32, i32) {
    %c0_i32 = arith.constant 0 : i32
    %c0_i32_0 = arith.constant 0 : i32
    %c0_i32_1 = arith.constant 0 : i32
    return %c0_i32, %c0_i32_0 : i32, i32
  }
  func.func @transform_5(%arg0: i32, %arg1: i32) -> (i32, i32, i32, i32) {
    %c0_i32 = arith.constant 0 : i32
    %c0_i32_0 = arith.constant 0 : i32
    %c0_i32_1 = arith.constant 0 : i32
    return %arg0, %arg1, %c0_i32, %c0_i32_0 : i32, i32, i32, i32
  }
}

module attributes {stable_mosaic.version = 11 : i64} {
  func.func @_conv_relu_pool_bn_kernel(%arg0: i32, %arg1: i32, %arg2: memref<1x2x4x108x36xbf16, #tpu.memory_space<vmem>>, %arg3: memref<8x108xbf16, #tpu.memory_space<vmem>>, %arg4: memref<8x1xf32, #tpu.memory_space<vmem>>, %arg5: memref<8x1xf32, #tpu.memory_space<vmem>>, %arg6: memref<8x1xf32, #tpu.memory_space<vmem>>, %arg7: memref<1x1x8x36xf32, #tpu.memory_space<vmem>>) attributes {dimension_semantics = [#tpu.dimension_semantics<parallel>, #tpu.dimension_semantics<parallel>], iteration_bounds = array<i64: 2, 6>, scalar_prefetch = 0 : i64, scratch_operands = 0 : i64, tpu.core_type = #tpu.core_type<tc>, window_params = [{transform_indices = @transform_0, window_bounds = array<i64: 1, 2, 4, 108, 36>}, {pipeline_mode = #tpu.pipeline_mode<synchronous>, transform_indices = @transform_1, window_bounds = array<i64: 8, 108>}, {pipeline_mode = #tpu.pipeline_mode<synchronous>, transform_indices = @transform_2, window_bounds = array<i64: 8, 1>}, {pipeline_mode = #tpu.pipeline_mode<synchronous>, transform_indices = @transform_3, window_bounds = array<i64: 8, 1>}, {pipeline_mode = #tpu.pipeline_mode<synchronous>, transform_indices = @transform_4, window_bounds = array<i64: 8, 1>}, {transform_indices = @transform_5, window_bounds = array<i64: 1, 1, 8, 36>}]} {
    %c0 = arith.constant 0 : index
    %c0_0 = arith.constant 0 : index
    %0 = vector.load %arg3[%c0, %c0_0] : memref<8x108xbf16, #tpu.memory_space<vmem>>, vector<8x108xbf16>
    %c0_1 = arith.constant 0 : index
    %c0_2 = arith.constant 0 : index
    %1 = vector.load %arg4[%c0_1, %c0_2] : memref<8x1xf32, #tpu.memory_space<vmem>>, vector<8x1xf32>
    %c0_3 = arith.constant 0 : index
    %c0_4 = arith.constant 0 : index
    %c0_5 = arith.constant 0 : index
    %c0_6 = arith.constant 0 : index
    %c0_7 = arith.constant 0 : index
    %2 = vector.load %arg2[%c0_3, %c0_4, %c0_5, %c0_6, %c0_7] : memref<1x2x4x108x36xbf16, #tpu.memory_space<vmem>>, vector<1x1x1x108x36xbf16>
    %3 = vector.shape_cast %2 : vector<1x1x1x108x36xbf16> to vector<108x36xbf16>
    %cst = arith.constant dense<0.000000e+00> : vector<8x36xf32>
    %4 = tpu.matmul %0, %3, %cst {dimension_numbers = #tpu.dot_dimension_numbers<[1], [0], [0], [1], [0, 0, 1, 1], [], []>} : vector<8x108xbf16>, vector<108x36xbf16>, vector<8x36xf32> -> vector<8x36xf32>
    %5 = vector.broadcast %1 : vector<8x1xf32> to vector<8x36xf32>
    %6 = arith.addf %4, %5 : vector<8x36xf32>
    %cst_8 = arith.constant 0.000000e+00 : f32
    %7 = vector.broadcast %cst_8 : f32 to vector<8x36xf32>
    %8 = arith.maximumf %6, %7 : vector<8x36xf32>
    %c0_9 = arith.constant 0 : index
    %c0_10 = arith.constant 0 : index
    %c1 = arith.constant 1 : index
    %c0_11 = arith.constant 0 : index
    %c0_12 = arith.constant 0 : index
    %9 = vector.load %arg2[%c0_9, %c0_10, %c1, %c0_11, %c0_12] : memref<1x2x4x108x36xbf16, #tpu.memory_space<vmem>>, vector<1x1x1x108x36xbf16>
    %10 = vector.shape_cast %9 : vector<1x1x1x108x36xbf16> to vector<108x36xbf16>
    %cst_13 = arith.constant dense<0.000000e+00> : vector<8x36xf32>
    %11 = tpu.matmul %0, %10, %cst_13 {dimension_numbers = #tpu.dot_dimension_numbers<[1], [0], [0], [1], [0, 0, 1, 1], [], []>} : vector<8x108xbf16>, vector<108x36xbf16>, vector<8x36xf32> -> vector<8x36xf32>
    %12 = vector.broadcast %1 : vector<8x1xf32> to vector<8x36xf32>
    %13 = arith.addf %11, %12 : vector<8x36xf32>
    %cst_14 = arith.constant 0.000000e+00 : f32
    %14 = vector.broadcast %cst_14 : f32 to vector<8x36xf32>
    %15 = arith.maximumf %13, %14 : vector<8x36xf32>
    %16 = arith.maximumf %8, %15 : vector<8x36xf32>
    %c0_15 = arith.constant 0 : index
    %c0_16 = arith.constant 0 : index
    %c2 = arith.constant 2 : index
    %c0_17 = arith.constant 0 : index
    %c0_18 = arith.constant 0 : index
    %17 = vector.load %arg2[%c0_15, %c0_16, %c2, %c0_17, %c0_18] : memref<1x2x4x108x36xbf16, #tpu.memory_space<vmem>>, vector<1x1x1x108x36xbf16>
    %18 = vector.shape_cast %17 : vector<1x1x1x108x36xbf16> to vector<108x36xbf16>
    %cst_19 = arith.constant dense<0.000000e+00> : vector<8x36xf32>
    %19 = tpu.matmul %0, %18, %cst_19 {dimension_numbers = #tpu.dot_dimension_numbers<[1], [0], [0], [1], [0, 0, 1, 1], [], []>} : vector<8x108xbf16>, vector<108x36xbf16>, vector<8x36xf32> -> vector<8x36xf32>
    %20 = vector.broadcast %1 : vector<8x1xf32> to vector<8x36xf32>
    %21 = arith.addf %19, %20 : vector<8x36xf32>
    %cst_20 = arith.constant 0.000000e+00 : f32
    %22 = vector.broadcast %cst_20 : f32 to vector<8x36xf32>
    %23 = arith.maximumf %21, %22 : vector<8x36xf32>
    %24 = arith.maximumf %16, %23 : vector<8x36xf32>
    %c0_21 = arith.constant 0 : index
    %c0_22 = arith.constant 0 : index
    %c3 = arith.constant 3 : index
    %c0_23 = arith.constant 0 : index
    %c0_24 = arith.constant 0 : index
    %25 = vector.load %arg2[%c0_21, %c0_22, %c3, %c0_23, %c0_24] : memref<1x2x4x108x36xbf16, #tpu.memory_space<vmem>>, vector<1x1x1x108x36xbf16>
    %26 = vector.shape_cast %25 : vector<1x1x1x108x36xbf16> to vector<108x36xbf16>
    %cst_25 = arith.constant dense<0.000000e+00> : vector<8x36xf32>
    %27 = tpu.matmul %0, %26, %cst_25 {dimension_numbers = #tpu.dot_dimension_numbers<[1], [0], [0], [1], [0, 0, 1, 1], [], []>} : vector<8x108xbf16>, vector<108x36xbf16>, vector<8x36xf32> -> vector<8x36xf32>
    %28 = vector.broadcast %1 : vector<8x1xf32> to vector<8x36xf32>
    %29 = arith.addf %27, %28 : vector<8x36xf32>
    %cst_26 = arith.constant 0.000000e+00 : f32
    %30 = vector.broadcast %cst_26 : f32 to vector<8x36xf32>
    %31 = arith.maximumf %29, %30 : vector<8x36xf32>
    %32 = arith.maximumf %24, %31 : vector<8x36xf32>
    %c0_27 = arith.constant 0 : index
    %c1_28 = arith.constant 1 : index
    %c0_29 = arith.constant 0 : index
    %c0_30 = arith.constant 0 : index
    %c0_31 = arith.constant 0 : index
    %33 = vector.load %arg2[%c0_27, %c1_28, %c0_29, %c0_30, %c0_31] : memref<1x2x4x108x36xbf16, #tpu.memory_space<vmem>>, vector<1x1x1x108x36xbf16>
    %34 = vector.shape_cast %33 : vector<1x1x1x108x36xbf16> to vector<108x36xbf16>
    %cst_32 = arith.constant dense<0.000000e+00> : vector<8x36xf32>
    %35 = tpu.matmul %0, %34, %cst_32 {dimension_numbers = #tpu.dot_dimension_numbers<[1], [0], [0], [1], [0, 0, 1, 1], [], []>} : vector<8x108xbf16>, vector<108x36xbf16>, vector<8x36xf32> -> vector<8x36xf32>
    %36 = vector.broadcast %1 : vector<8x1xf32> to vector<8x36xf32>
    %37 = arith.addf %35, %36 : vector<8x36xf32>
    %cst_33 = arith.constant 0.000000e+00 : f32
    %38 = vector.broadcast %cst_33 : f32 to vector<8x36xf32>
    %39 = arith.maximumf %37, %38 : vector<8x36xf32>
    %40 = arith.maximumf %32, %39 : vector<8x36xf32>
    %c0_34 = arith.constant 0 : index
    %c1_35 = arith.constant 1 : index
    %c1_36 = arith.constant 1 : index
    %c0_37 = arith.constant 0 : index
    %c0_38 = arith.constant 0 : index
    %41 = vector.load %arg2[%c0_34, %c1_35, %c1_36, %c0_37, %c0_38] : memref<1x2x4x108x36xbf16, #tpu.memory_space<vmem>>, vector<1x1x1x108x36xbf16>
    %42 = vector.shape_cast %41 : vector<1x1x1x108x36xbf16> to vector<108x36xbf16>
    %cst_39 = arith.constant dense<0.000000e+00> : vector<8x36xf32>
    %43 = tpu.matmul %0, %42, %cst_39 {dimension_numbers = #tpu.dot_dimension_numbers<[1], [0], [0], [1], [0, 0, 1, 1], [], []>} : vector<8x108xbf16>, vector<108x36xbf16>, vector<8x36xf32> -> vector<8x36xf32>
    %44 = vector.broadcast %1 : vector<8x1xf32> to vector<8x36xf32>
    %45 = arith.addf %43, %44 : vector<8x36xf32>
    %cst_40 = arith.constant 0.000000e+00 : f32
    %46 = vector.broadcast %cst_40 : f32 to vector<8x36xf32>
    %47 = arith.maximumf %45, %46 : vector<8x36xf32>
    %48 = arith.maximumf %40, %47 : vector<8x36xf32>
    %c0_41 = arith.constant 0 : index
    %c1_42 = arith.constant 1 : index
    %c2_43 = arith.constant 2 : index
    %c0_44 = arith.constant 0 : index
    %c0_45 = arith.constant 0 : index
    %49 = vector.load %arg2[%c0_41, %c1_42, %c2_43, %c0_44, %c0_45] : memref<1x2x4x108x36xbf16, #tpu.memory_space<vmem>>, vector<1x1x1x108x36xbf16>
    %50 = vector.shape_cast %49 : vector<1x1x1x108x36xbf16> to vector<108x36xbf16>
    %cst_46 = arith.constant dense<0.000000e+00> : vector<8x36xf32>
    %51 = tpu.matmul %0, %50, %cst_46 {dimension_numbers = #tpu.dot_dimension_numbers<[1], [0], [0], [1], [0, 0, 1, 1], [], []>} : vector<8x108xbf16>, vector<108x36xbf16>, vector<8x36xf32> -> vector<8x36xf32>
    %52 = vector.broadcast %1 : vector<8x1xf32> to vector<8x36xf32>
    %53 = arith.addf %51, %52 : vector<8x36xf32>
    %cst_47 = arith.constant 0.000000e+00 : f32
    %54 = vector.broadcast %cst_47 : f32 to vector<8x36xf32>
    %55 = arith.maximumf %53, %54 : vector<8x36xf32>
    %56 = arith.maximumf %48, %55 : vector<8x36xf32>
    %c0_48 = arith.constant 0 : index
    %c1_49 = arith.constant 1 : index
    %c3_50 = arith.constant 3 : index
    %c0_51 = arith.constant 0 : index
    %c0_52 = arith.constant 0 : index
    %57 = vector.load %arg2[%c0_48, %c1_49, %c3_50, %c0_51, %c0_52] : memref<1x2x4x108x36xbf16, #tpu.memory_space<vmem>>, vector<1x1x1x108x36xbf16>
    %58 = vector.shape_cast %57 : vector<1x1x1x108x36xbf16> to vector<108x36xbf16>
    %cst_53 = arith.constant dense<0.000000e+00> : vector<8x36xf32>
    %59 = tpu.matmul %0, %58, %cst_53 {dimension_numbers = #tpu.dot_dimension_numbers<[1], [0], [0], [1], [0, 0, 1, 1], [], []>} : vector<8x108xbf16>, vector<108x36xbf16>, vector<8x36xf32> -> vector<8x36xf32>
    %60 = vector.broadcast %1 : vector<8x1xf32> to vector<8x36xf32>
    %61 = arith.addf %59, %60 : vector<8x36xf32>
    %cst_54 = arith.constant 0.000000e+00 : f32
    %62 = vector.broadcast %cst_54 : f32 to vector<8x36xf32>
    %63 = arith.maximumf %61, %62 : vector<8x36xf32>
    %64 = arith.maximumf %56, %63 : vector<8x36xf32>
    %c0_55 = arith.constant 0 : index
    %c0_56 = arith.constant 0 : index
    %65 = vector.load %arg5[%c0_55, %c0_56] : memref<8x1xf32, #tpu.memory_space<vmem>>, vector<8x1xf32>
    %66 = vector.broadcast %65 : vector<8x1xf32> to vector<8x36xf32>
    %67 = arith.mulf %64, %66 : vector<8x36xf32>
    %c0_57 = arith.constant 0 : index
    %c0_58 = arith.constant 0 : index
    %68 = vector.load %arg6[%c0_57, %c0_58] : memref<8x1xf32, #tpu.memory_space<vmem>>, vector<8x1xf32>
    %69 = vector.broadcast %68 : vector<8x1xf32> to vector<8x36xf32>
    %70 = arith.addf %67, %69 : vector<8x36xf32>
    %c0_59 = arith.constant 0 : index
    %c0_60 = arith.constant 0 : index
    %c0_61 = arith.constant 0 : index
    %c0_62 = arith.constant 0 : index
    %71 = vector.load %arg7[%c0_59, %c0_60, %c0_61, %c0_62] : memref<1x1x8x36xf32, #tpu.memory_space<vmem>>, vector<1x1x8x36xf32>
    %72 = vector.shape_cast %71 : vector<1x1x8x36xf32> to vector<8x36xf32>
    %73 = vector.shape_cast %70 : vector<8x36xf32> to vector<1x1x8x36xf32>
    tpu.vector_store %arg7[%c0_59, %c0_60, %c0_61, %c0_62], %73 {strides = array<i32>} : memref<1x1x8x36xf32, #tpu.memory_space<vmem>>, vector<1x1x8x36xf32>,
    return
  }
  func.func @transform_0(%arg0: i32, %arg1: i32) -> (i32, i32, i32, i32, i32) {
    %c0_i32 = arith.constant 0 : i32
    %c0_i32_0 = arith.constant 0 : i32
    %c0_i32_1 = arith.constant 0 : i32
    %c0_i32_2 = arith.constant 0 : i32
    return %arg0, %arg1, %c0_i32, %c0_i32_0, %c0_i32_1 : i32, i32, i32, i32, i32
  }
  func.func @transform_1(%arg0: i32, %arg1: i32) -> (i32, i32) {
    %c0_i32 = arith.constant 0 : i32
    %c0_i32_0 = arith.constant 0 : i32
    %c0_i32_1 = arith.constant 0 : i32
    return %c0_i32, %c0_i32_0 : i32, i32
  }
  func.func @transform_2(%arg0: i32, %arg1: i32) -> (i32, i32) {
    %c0_i32 = arith.constant 0 : i32
    %c0_i32_0 = arith.constant 0 : i32
    %c0_i32_1 = arith.constant 0 : i32
    return %c0_i32, %c0_i32_0 : i32, i32
  }
  func.func @transform_3(%arg0: i32, %arg1: i32) -> (i32, i32) {
    %c0_i32 = arith.constant 0 : i32
    %c0_i32_0 = arith.constant 0 : i32
    %c0_i32_1 = arith.constant 0 : i32
    return %c0_i32, %c0_i32_0 : i32, i32
  }
  func.func @transform_4(%arg0: i32, %arg1: i32) -> (i32, i32) {
    %c0_i32 = arith.constant 0 : i32
    %c0_i32_0 = arith.constant 0 : i32
    %c0_i32_1 = arith.constant 0 : i32
    return %c0_i32, %c0_i32_0 : i32, i32
  }
  func.func @transform_5(%arg0: i32, %arg1: i32) -> (i32, i32, i32, i32) {
    %c0_i32 = arith.constant 0 : i32
    %c0_i32_0 = arith.constant 0 : i32
    %c0_i32_1 = arith.constant 0 : i32
    return %arg0, %arg1, %c0_i32, %c0_i32_0 : i32, i32, i32, i32
  }
}

module attributes {stable_mosaic.version = 11 : i64} {
  func.func @_conv_relu_pool_bn_kernel(%arg0: i32, %arg1: i32, %arg2: memref<1x2x4x216x4xbf16, #tpu.memory_space<vmem>>, %arg3: memref<16x216xbf16, #tpu.memory_space<vmem>>, %arg4: memref<16x1xf32, #tpu.memory_space<vmem>>, %arg5: memref<16x1xf32, #tpu.memory_space<vmem>>, %arg6: memref<16x1xf32, #tpu.memory_space<vmem>>, %arg7: memref<1x1x16x4xf32, #tpu.memory_space<vmem>>) attributes {dimension_semantics = [#tpu.dimension_semantics<parallel>, #tpu.dimension_semantics<parallel>], iteration_bounds = array<i64: 2, 2>, scalar_prefetch = 0 : i64, scratch_operands = 0 : i64, tpu.core_type = #tpu.core_type<tc>, window_params = [{transform_indices = @transform_0, window_bounds = array<i64: 1, 2, 4, 216, 4>}, {pipeline_mode = #tpu.pipeline_mode<synchronous>, transform_indices = @transform_1, window_bounds = array<i64: 16, 216>}, {pipeline_mode = #tpu.pipeline_mode<synchronous>, transform_indices = @transform_2, window_bounds = array<i64: 16, 1>}, {pipeline_mode = #tpu.pipeline_mode<synchronous>, transform_indices = @transform_3, window_bounds = array<i64: 16, 1>}, {pipeline_mode = #tpu.pipeline_mode<synchronous>, transform_indices = @transform_4, window_bounds = array<i64: 16, 1>}, {transform_indices = @transform_5, window_bounds = array<i64: 1, 1, 16, 4>}]} {
    %c0 = arith.constant 0 : index
    %c0_0 = arith.constant 0 : index
    %0 = vector.load %arg3[%c0, %c0_0] : memref<16x216xbf16, #tpu.memory_space<vmem>>, vector<16x216xbf16>
    %c0_1 = arith.constant 0 : index
    %c0_2 = arith.constant 0 : index
    %1 = vector.load %arg4[%c0_1, %c0_2] : memref<16x1xf32, #tpu.memory_space<vmem>>, vector<16x1xf32>
    %c0_3 = arith.constant 0 : index
    %c0_4 = arith.constant 0 : index
    %c0_5 = arith.constant 0 : index
    %c0_6 = arith.constant 0 : index
    %c0_7 = arith.constant 0 : index
    %2 = vector.load %arg2[%c0_3, %c0_4, %c0_5, %c0_6, %c0_7] : memref<1x2x4x216x4xbf16, #tpu.memory_space<vmem>>, vector<1x1x1x216x4xbf16>
    %3 = vector.shape_cast %2 : vector<1x1x1x216x4xbf16> to vector<216x4xbf16>
    %cst = arith.constant dense<0.000000e+00> : vector<16x4xf32>
    %4 = tpu.matmul %0, %3, %cst {dimension_numbers = #tpu.dot_dimension_numbers<[1], [0], [0], [1], [0, 0, 1, 1], [], []>} : vector<16x216xbf16>, vector<216x4xbf16>, vector<16x4xf32> -> vector<16x4xf32>
    %5 = vector.broadcast %1 : vector<16x1xf32> to vector<16x4xf32>
    %6 = arith.addf %4, %5 : vector<16x4xf32>
    %cst_8 = arith.constant 0.000000e+00 : f32
    %7 = vector.broadcast %cst_8 : f32 to vector<16x4xf32>
    %8 = arith.maximumf %6, %7 : vector<16x4xf32>
    %c0_9 = arith.constant 0 : index
    %c0_10 = arith.constant 0 : index
    %c1 = arith.constant 1 : index
    %c0_11 = arith.constant 0 : index
    %c0_12 = arith.constant 0 : index
    %9 = vector.load %arg2[%c0_9, %c0_10, %c1, %c0_11, %c0_12] : memref<1x2x4x216x4xbf16, #tpu.memory_space<vmem>>, vector<1x1x1x216x4xbf16>
    %10 = vector.shape_cast %9 : vector<1x1x1x216x4xbf16> to vector<216x4xbf16>
    %cst_13 = arith.constant dense<0.000000e+00> : vector<16x4xf32>
    %11 = tpu.matmul %0, %10, %cst_13 {dimension_numbers = #tpu.dot_dimension_numbers<[1], [0], [0], [1], [0, 0, 1, 1], [], []>} : vector<16x216xbf16>, vector<216x4xbf16>, vector<16x4xf32> -> vector<16x4xf32>
    %12 = vector.broadcast %1 : vector<16x1xf32> to vector<16x4xf32>
    %13 = arith.addf %11, %12 : vector<16x4xf32>
    %cst_14 = arith.constant 0.000000e+00 : f32
    %14 = vector.broadcast %cst_14 : f32 to vector<16x4xf32>
    %15 = arith.maximumf %13, %14 : vector<16x4xf32>
    %16 = arith.maximumf %8, %15 : vector<16x4xf32>
    %c0_15 = arith.constant 0 : index
    %c0_16 = arith.constant 0 : index
    %c2 = arith.constant 2 : index
    %c0_17 = arith.constant 0 : index
    %c0_18 = arith.constant 0 : index
    %17 = vector.load %arg2[%c0_15, %c0_16, %c2, %c0_17, %c0_18] : memref<1x2x4x216x4xbf16, #tpu.memory_space<vmem>>, vector<1x1x1x216x4xbf16>
    %18 = vector.shape_cast %17 : vector<1x1x1x216x4xbf16> to vector<216x4xbf16>
    %cst_19 = arith.constant dense<0.000000e+00> : vector<16x4xf32>
    %19 = tpu.matmul %0, %18, %cst_19 {dimension_numbers = #tpu.dot_dimension_numbers<[1], [0], [0], [1], [0, 0, 1, 1], [], []>} : vector<16x216xbf16>, vector<216x4xbf16>, vector<16x4xf32> -> vector<16x4xf32>
    %20 = vector.broadcast %1 : vector<16x1xf32> to vector<16x4xf32>
    %21 = arith.addf %19, %20 : vector<16x4xf32>
    %cst_20 = arith.constant 0.000000e+00 : f32
    %22 = vector.broadcast %cst_20 : f32 to vector<16x4xf32>
    %23 = arith.maximumf %21, %22 : vector<16x4xf32>
    %24 = arith.maximumf %16, %23 : vector<16x4xf32>
    %c0_21 = arith.constant 0 : index
    %c0_22 = arith.constant 0 : index
    %c3 = arith.constant 3 : index
    %c0_23 = arith.constant 0 : index
    %c0_24 = arith.constant 0 : index
    %25 = vector.load %arg2[%c0_21, %c0_22, %c3, %c0_23, %c0_24] : memref<1x2x4x216x4xbf16, #tpu.memory_space<vmem>>, vector<1x1x1x216x4xbf16>
    %26 = vector.shape_cast %25 : vector<1x1x1x216x4xbf16> to vector<216x4xbf16>
    %cst_25 = arith.constant dense<0.000000e+00> : vector<16x4xf32>
    %27 = tpu.matmul %0, %26, %cst_25 {dimension_numbers = #tpu.dot_dimension_numbers<[1], [0], [0], [1], [0, 0, 1, 1], [], []>} : vector<16x216xbf16>, vector<216x4xbf16>, vector<16x4xf32> -> vector<16x4xf32>
    %28 = vector.broadcast %1 : vector<16x1xf32> to vector<16x4xf32>
    %29 = arith.addf %27, %28 : vector<16x4xf32>
    %cst_26 = arith.constant 0.000000e+00 : f32
    %30 = vector.broadcast %cst_26 : f32 to vector<16x4xf32>
    %31 = arith.maximumf %29, %30 : vector<16x4xf32>
    %32 = arith.maximumf %24, %31 : vector<16x4xf32>
    %c0_27 = arith.constant 0 : index
    %c1_28 = arith.constant 1 : index
    %c0_29 = arith.constant 0 : index
    %c0_30 = arith.constant 0 : index
    %c0_31 = arith.constant 0 : index
    %33 = vector.load %arg2[%c0_27, %c1_28, %c0_29, %c0_30, %c0_31] : memref<1x2x4x216x4xbf16, #tpu.memory_space<vmem>>, vector<1x1x1x216x4xbf16>
    %34 = vector.shape_cast %33 : vector<1x1x1x216x4xbf16> to vector<216x4xbf16>
    %cst_32 = arith.constant dense<0.000000e+00> : vector<16x4xf32>
    %35 = tpu.matmul %0, %34, %cst_32 {dimension_numbers = #tpu.dot_dimension_numbers<[1], [0], [0], [1], [0, 0, 1, 1], [], []>} : vector<16x216xbf16>, vector<216x4xbf16>, vector<16x4xf32> -> vector<16x4xf32>
    %36 = vector.broadcast %1 : vector<16x1xf32> to vector<16x4xf32>
    %37 = arith.addf %35, %36 : vector<16x4xf32>
    %cst_33 = arith.constant 0.000000e+00 : f32
    %38 = vector.broadcast %cst_33 : f32 to vector<16x4xf32>
    %39 = arith.maximumf %37, %38 : vector<16x4xf32>
    %40 = arith.maximumf %32, %39 : vector<16x4xf32>
    %c0_34 = arith.constant 0 : index
    %c1_35 = arith.constant 1 : index
    %c1_36 = arith.constant 1 : index
    %c0_37 = arith.constant 0 : index
    %c0_38 = arith.constant 0 : index
    %41 = vector.load %arg2[%c0_34, %c1_35, %c1_36, %c0_37, %c0_38] : memref<1x2x4x216x4xbf16, #tpu.memory_space<vmem>>, vector<1x1x1x216x4xbf16>
    %42 = vector.shape_cast %41 : vector<1x1x1x216x4xbf16> to vector<216x4xbf16>
    %cst_39 = arith.constant dense<0.000000e+00> : vector<16x4xf32>
    %43 = tpu.matmul %0, %42, %cst_39 {dimension_numbers = #tpu.dot_dimension_numbers<[1], [0], [0], [1], [0, 0, 1, 1], [], []>} : vector<16x216xbf16>, vector<216x4xbf16>, vector<16x4xf32> -> vector<16x4xf32>
    %44 = vector.broadcast %1 : vector<16x1xf32> to vector<16x4xf32>
    %45 = arith.addf %43, %44 : vector<16x4xf32>
    %cst_40 = arith.constant 0.000000e+00 : f32
    %46 = vector.broadcast %cst_40 : f32 to vector<16x4xf32>
    %47 = arith.maximumf %45, %46 : vector<16x4xf32>
    %48 = arith.maximumf %40, %47 : vector<16x4xf32>
    %c0_41 = arith.constant 0 : index
    %c1_42 = arith.constant 1 : index
    %c2_43 = arith.constant 2 : index
    %c0_44 = arith.constant 0 : index
    %c0_45 = arith.constant 0 : index
    %49 = vector.load %arg2[%c0_41, %c1_42, %c2_43, %c0_44, %c0_45] : memref<1x2x4x216x4xbf16, #tpu.memory_space<vmem>>, vector<1x1x1x216x4xbf16>
    %50 = vector.shape_cast %49 : vector<1x1x1x216x4xbf16> to vector<216x4xbf16>
    %cst_46 = arith.constant dense<0.000000e+00> : vector<16x4xf32>
    %51 = tpu.matmul %0, %50, %cst_46 {dimension_numbers = #tpu.dot_dimension_numbers<[1], [0], [0], [1], [0, 0, 1, 1], [], []>} : vector<16x216xbf16>, vector<216x4xbf16>, vector<16x4xf32> -> vector<16x4xf32>
    %52 = vector.broadcast %1 : vector<16x1xf32> to vector<16x4xf32>
    %53 = arith.addf %51, %52 : vector<16x4xf32>
    %cst_47 = arith.constant 0.000000e+00 : f32
    %54 = vector.broadcast %cst_47 : f32 to vector<16x4xf32>
    %55 = arith.maximumf %53, %54 : vector<16x4xf32>
    %56 = arith.maximumf %48, %55 : vector<16x4xf32>
    %c0_48 = arith.constant 0 : index
    %c1_49 = arith.constant 1 : index
    %c3_50 = arith.constant 3 : index
    %c0_51 = arith.constant 0 : index
    %c0_52 = arith.constant 0 : index
    %57 = vector.load %arg2[%c0_48, %c1_49, %c3_50, %c0_51, %c0_52] : memref<1x2x4x216x4xbf16, #tpu.memory_space<vmem>>, vector<1x1x1x216x4xbf16>
    %58 = vector.shape_cast %57 : vector<1x1x1x216x4xbf16> to vector<216x4xbf16>
    %cst_53 = arith.constant dense<0.000000e+00> : vector<16x4xf32>
    %59 = tpu.matmul %0, %58, %cst_53 {dimension_numbers = #tpu.dot_dimension_numbers<[1], [0], [0], [1], [0, 0, 1, 1], [], []>} : vector<16x216xbf16>, vector<216x4xbf16>, vector<16x4xf32> -> vector<16x4xf32>
    %60 = vector.broadcast %1 : vector<16x1xf32> to vector<16x4xf32>
    %61 = arith.addf %59, %60 : vector<16x4xf32>
    %cst_54 = arith.constant 0.000000e+00 : f32
    %62 = vector.broadcast %cst_54 : f32 to vector<16x4xf32>
    %63 = arith.maximumf %61, %62 : vector<16x4xf32>
    %64 = arith.maximumf %56, %63 : vector<16x4xf32>
    %c0_55 = arith.constant 0 : index
    %c0_56 = arith.constant 0 : index
    %65 = vector.load %arg5[%c0_55, %c0_56] : memref<16x1xf32, #tpu.memory_space<vmem>>, vector<16x1xf32>
    %66 = vector.broadcast %65 : vector<16x1xf32> to vector<16x4xf32>
    %67 = arith.mulf %64, %66 : vector<16x4xf32>
    %c0_57 = arith.constant 0 : index
    %c0_58 = arith.constant 0 : index
    %68 = vector.load %arg6[%c0_57, %c0_58] : memref<16x1xf32, #tpu.memory_space<vmem>>, vector<16x1xf32>
    %69 = vector.broadcast %68 : vector<16x1xf32> to vector<16x4xf32>
    %70 = arith.addf %67, %69 : vector<16x4xf32>
    %c0_59 = arith.constant 0 : index
    %c0_60 = arith.constant 0 : index
    %c0_61 = arith.constant 0 : index
    %c0_62 = arith.constant 0 : index
    %71 = vector.load %arg7[%c0_59, %c0_60, %c0_61, %c0_62] : memref<1x1x16x4xf32, #tpu.memory_space<vmem>>, vector<1x1x16x4xf32>
    %72 = vector.shape_cast %71 : vector<1x1x16x4xf32> to vector<16x4xf32>
    %73 = vector.shape_cast %70 : vector<16x4xf32> to vector<1x1x16x4xf32>
    tpu.vector_store %arg7[%c0_59, %c0_60, %c0_61, %c0_62], %73 {strides = array<i32>} : memref<1x1x16x4xf32, #tpu.memory_space<vmem>>, vector<1x1x16x4xf32>,
    return
  }
  func.func @transform_0(%arg0: i32, %arg1: i32) -> (i32, i32, i32, i32, i32) {
    %c0_i32 = arith.constant 0 : i32
    %c0_i32_0 = arith.constant 0 : i32
    %c0_i32_1 = arith.constant 0 : i32
    %c0_i32_2 = arith.constant 0 : i32
    return %arg0, %arg1, %c0_i32, %c0_i32_0, %c0_i32_1 : i32, i32, i32, i32, i32
  }
  func.func @transform_1(%arg0: i32, %arg1: i32) -> (i32, i32) {
    %c0_i32 = arith.constant 0 : i32
    %c0_i32_0 = arith.constant 0 : i32
    %c0_i32_1 = arith.constant 0 : i32
    return %c0_i32, %c0_i32_0 : i32, i32
  }
  func.func @transform_2(%arg0: i32, %arg1: i32) -> (i32, i32) {
    %c0_i32 = arith.constant 0 : i32
    %c0_i32_0 = arith.constant 0 : i32
    %c0_i32_1 = arith.constant 0 : i32
    return %c0_i32, %c0_i32_0 : i32, i32
  }
  func.func @transform_3(%arg0: i32, %arg1: i32) -> (i32, i32) {
    %c0_i32 = arith.constant 0 : i32
    %c0_i32_0 = arith.constant 0 : i32
    %c0_i32_1 = arith.constant 0 : i32
    return %c0_i32, %c0_i32_0 : i32, i32
  }
  func.func @transform_4(%arg0: i32, %arg1: i32) -> (i32, i32) {
    %c0_i32 = arith.constant 0 : i32
    %c0_i32_0 = arith.constant 0 : i32
    %c0_i32_1 = arith.constant 0 : i32
    return %c0_i32, %c0_i32_0 : i32, i32
  }
  func.func @transform_5(%arg0: i32, %arg1: i32) -> (i32, i32, i32, i32) {
    %c0_i32 = arith.constant 0 : i32
    %c0_i32_0 = arith.constant 0 : i32
    %c0_i32_1 = arith.constant 0 : i32
    return %arg0, %arg1, %c0_i32, %c0_i32_0 : i32, i32, i32, i32
  }
}

module attributes {stable_mosaic.version = 11 : i64} {
  func.func @_head_kernel(%arg0: i32, %arg1: memref<2x128xf32, #tpu.memory_space<vmem>>, %arg2: memref<128x128xf32, #tpu.memory_space<vmem>>, %arg3: memref<1x128xf32, #tpu.memory_space<vmem>>, %arg4: memref<3x128xf32, #tpu.memory_space<vmem>>, %arg5: memref<1x3xf32, #tpu.memory_space<vmem>>, %arg6: memref<2x3xf32, #tpu.memory_space<vmem>>, %arg7: memref<2x128xf32, #tpu.memory_space<vmem>>) attributes {dimension_semantics = [#tpu.dimension_semantics<arbitrary>], iteration_bounds = array<i64: 1>, scalar_prefetch = 0 : i64, scratch_operands = 1 : i64, tpu.core_type = #tpu.core_type<tc>, window_params = [{transform_indices = @transform_0, window_bounds = array<i64: 2, 128>}, {transform_indices = @transform_1, window_bounds = array<i64: 128, 128>}, {pipeline_mode = #tpu.pipeline_mode<synchronous>, transform_indices = @transform_2, window_bounds = array<i64: 1, 128>}, {pipeline_mode = #tpu.pipeline_mode<synchronous>, transform_indices = @transform_3, window_bounds = array<i64: 3, 128>}, {pipeline_mode = #tpu.pipeline_mode<synchronous>, transform_indices = @transform_4, window_bounds = array<i64: 1, 3>}, {pipeline_mode = #tpu.pipeline_mode<synchronous>, transform_indices = @transform_5, window_bounds = array<i64: 2, 3>}]} {
    %c0_i32 = arith.constant 0 : i32
    %0 = arith.cmpi eq, %arg0, %c0_i32 : i32
    %1 = arith.extui %0 : i1 to i32
    %c0_i32_0 = arith.constant 0 : i32
    %2 = arith.cmpi ne, %1, %c0_i32_0 : i32
    scf.if %2 {
      %cst_10 = arith.constant 0.000000e+00 : f32
      %12 = vector.broadcast %cst_10 : f32 to vector<2x128xf32>
      %c0_11 = arith.constant 0 : index
      %c0_12 = arith.constant 0 : index
      %13 = vector.load %arg7[%c0_11, %c0_12] : memref<2x128xf32, #tpu.memory_space<vmem>>, vector<2x128xf32>
      tpu.vector_store %arg7[%c0_11, %c0_12], %12 {strides = array<i32>} : memref<2x128xf32, #tpu.memory_space<vmem>>, vector<2x128xf32>,
    } else {
    }
    %c0 = arith.constant 0 : index
    %c0_1 = arith.constant 0 : index
    %3 = vector.load %arg7[%c0, %c0_1] : memref<2x128xf32, #tpu.memory_space<vmem>>, vector<2x128xf32>
    %c0_2 = arith.constant 0 : index
    %c0_3 = arith.constant 0 : index
    %4 = vector.load %arg1[%c0_2, %c0_3] : memref<2x128xf32, #tpu.memory_space<vmem>>, vector<2x128xf32>
    %c0_4 = arith.constant 0 : index
    %c0_5 = arith.constant 0 : index
    %5 = vector.load %arg2[%c0_4, %c0_5] : memref<128x128xf32, #tpu.memory_space<vmem>>, vector<128x128xf32>
    %cst = arith.constant dense<0.000000e+00> : vector<2x128xf32>
    %6 = tpu.matmul %4, %5, %cst {dimension_numbers = #tpu.dot_dimension_numbers<[1], [1], [0], [0], [0, 0, 1, 0], [], []>} : vector<2x128xf32>, vector<128x128xf32>, vector<2x128xf32> -> vector<2x128xf32>
    %7 = arith.addf %3, %6 : vector<2x128xf32>
    %c0_6 = arith.constant 0 : index
    %c0_7 = arith.constant 0 : index
    %8 = vector.load %arg7[%c0_6, %c0_7] : memref<2x128xf32, #tpu.memory_space<vmem>>, vector<2x128xf32>
    tpu.vector_store %arg7[%c0_6, %c0_7], %7 {strides = array<i32>} : memref<2x128xf32, #tpu.memory_space<vmem>>, vector<2x128xf32>,
    %c0_i32_8 = arith.constant 0 : i32
    %9 = arith.cmpi eq, %arg0, %c0_i32_8 : i32
    %10 = arith.extui %9 : i1 to i32
    %c0_i32_9 = arith.constant 0 : i32
    %11 = arith.cmpi ne, %10, %c0_i32_9 : i32
    scf.if %11 {
      %c0_10 = arith.constant 0 : index
      %c0_11 = arith.constant 0 : index
      %12 = vector.load %arg7[%c0_10, %c0_11] : memref<2x128xf32, #tpu.memory_space<vmem>>, vector<2x128xf32>
      %c0_12 = arith.constant 0 : index
      %c0_13 = arith.constant 0 : index
      %13 = vector.load %arg3[%c0_12, %c0_13] : memref<1x128xf32, #tpu.memory_space<vmem>>, vector<1x128xf32>
      %14 = vector.broadcast %13 : vector<1x128xf32> to vector<2x128xf32>
      %15 = arith.addf %12, %14 : vector<2x128xf32>
      %cst_14 = arith.constant 0.000000e+00 : f32
      %16 = vector.broadcast %cst_14 : f32 to vector<2x128xf32>
      %17 = arith.cmpf oge, %15, %16 : vector<2x128xf32>
      %cst_15 = arith.constant 0.00999999977 : f32
      %18 = vector.broadcast %cst_15 : f32 to vector<2x128xf32>
      %19 = arith.mulf %18, %15 : vector<2x128xf32>
      %20 = arith.select %17, %15, %19 : vector<2x128xi1>, vector<2x128xf32>
      %c0_16 = arith.constant 0 : index
      %c0_17 = arith.constant 0 : index
      %21 = vector.load %arg4[%c0_16, %c0_17] : memref<3x128xf32, #tpu.memory_space<vmem>>, vector<3x128xf32>
      %cst_18 = arith.constant dense<0.000000e+00> : vector<2x3xf32>
      %22 = tpu.matmul %20, %21, %cst_18 {dimension_numbers = #tpu.dot_dimension_numbers<[1], [1], [0], [0], [0, 0, 1, 0], [], []>} : vector<2x128xf32>, vector<3x128xf32>, vector<2x3xf32> -> vector<2x3xf32>
      %c0_19 = arith.constant 0 : index
      %c0_20 = arith.constant 0 : index
      %23 = vector.load %arg5[%c0_19, %c0_20] : memref<1x3xf32, #tpu.memory_space<vmem>>, vector<1x3xf32>
      %24 = vector.broadcast %23 : vector<1x3xf32> to vector<2x3xf32>
      %25 = arith.addf %22, %24 : vector<2x3xf32>
      %c0_21 = arith.constant 0 : index
      %c0_22 = arith.constant 0 : index
      %26 = vector.load %arg6[%c0_21, %c0_22] : memref<2x3xf32, #tpu.memory_space<vmem>>, vector<2x3xf32>
      tpu.vector_store %arg6[%c0_21, %c0_22], %25 {strides = array<i32>} : memref<2x3xf32, #tpu.memory_space<vmem>>, vector<2x3xf32>,
    } else {
    }
    return
  }
  func.func @transform_0(%arg0: i32) -> (i32, i32) {
    %c0_i32 = arith.constant 0 : i32
    %c0_i32_0 = arith.constant 0 : i32
    return %c0_i32, %arg0 : i32, i32
  }
  func.func @transform_1(%arg0: i32) -> (i32, i32) {
    %c0_i32 = arith.constant 0 : i32
    %c0_i32_0 = arith.constant 0 : i32
    return %c0_i32, %arg0 : i32, i32
  }
  func.func @transform_2(%arg0: i32) -> (i32, i32) {
    %c0_i32 = arith.constant 0 : i32
    %c0_i32_0 = arith.constant 0 : i32
    %c0_i32_1 = arith.constant 0 : i32
    return %c0_i32, %c0_i32_0 : i32, i32
  }
  func.func @transform_3(%arg0: i32) -> (i32, i32) {
    %c0_i32 = arith.constant 0 : i32
    %c0_i32_0 = arith.constant 0 : i32
    %c0_i32_1 = arith.constant 0 : i32
    return %c0_i32, %c0_i32_0 : i32, i32
  }
  func.func @transform_4(%arg0: i32) -> (i32, i32) {
    %c0_i32 = arith.constant 0 : i32
    %c0_i32_0 = arith.constant 0 : i32
    %c0_i32_1 = arith.constant 0 : i32
    return %c0_i32, %c0_i32_0 : i32, i32
  }
  func.func @transform_5(%arg0: i32) -> (i32, i32) {
    %c0_i32 = arith.constant 0 : i32
    %c0_i32_0 = arith.constant 0 : i32
    %c0_i32_1 = arith.constant 0 : i32
    return %c0_i32, %c0_i32_0 : i32, i32
  }
}

</mosaic_0001>

<bundles_post_ra>
// kernel: cnn3d3_forward.4
= control target key start
LH: loop header
LB: loop body
LE: loop exit
PB: predicated region body
PF: predicated region fallthrough
CT: control target
= control target key end

     0   :  { %s1236_s18 = smov 0   ;;  %s1238_s19 = smov 0   ;;  %s1406_s0 = inlined_call_operand.vmem [shape: bf16[2,28,4,27,196], index: 0, kind: input, shape index: {}]   ;;  %s1407_s1 = inlined_call_operand.vmem [shape: bf16[4,27], index: 1, kind: input, shape index: {}]   ;;  %s1408_s2 = inlined_call_operand.vmem [shape: f32[4,1], index: 2, kind: input, shape index: {}]   ;;  %s1409_s3 = inlined_call_operand.vmem [shape: f32[4,1], index: 3, kind: input, shape index: {}]   ;;  %s1410_s4 = inlined_call_operand.vmem [shape: f32[4,1], index: 4, kind: input, shape index: {}]   ;;  %s1411_s5 = inlined_call_operand.vmem [shape: f32[2,14,4,196], index: 5, kind: output, shape index: {}]  }
   0x1   :  { %s1240_s20 = smov 0   ;;  %s1242_s21 = smov 0  }
   0x2   :  { %s1244_s22 = smov 0  }
   0x3 LB: > { %s24_s23 = sadd.s32 1, %s1194_s20  ;;  %s27_s24 = sadd.s32 1, %s1198_s21  ;;  %s1202_s22 = sphi %s1244_s22, %s15_s22   ;;  %s1198_s21 = sphi %s1242_s21, %s1415_s21   ;;  %s1194_s20 = sphi %s1240_s20, %s1414_s20   ;;  %s1190_s19 = sphi %s1238_s19, %s1413_s19   ;;  %s1186_s18 = sphi %s1236_s18, %s1412_s18  }
   0x4   : > { %p25_p0 = scmp.ge.s32.totalorder %s24_s23, 14  ;;  %p994_p1 = scmp.ge.s32.totalorder %s1202_s22, 1 }
   0x5   : > { %p209_p2 = scmp.lt.s32.totalorder %s1202_s22, 29 }
   0x6   : > { %s1417_s23 = smov (%p25_p0, %s24_s23), 0  ;;  %s1419_s24 = smov (!%p25_p0, %s27_s24), %s1198_s21 }
   0x7   : > { %p210_p3 = pnand %p994_p1, %p209_p2  ;;  %p29_p4 = scmp.ge.s32.totalorder %s1419_s24, 2 }
   0x8   : > { %s995_s25 = sshll.u32 (!%p210_p3), %s1186_s18, 1  ;;  %p247_p5 = scmp.lt.s32.totalorder (!%p210_p3), %s1190_s19, 1 }
   0x9   : > { %s1421_s24 = smov (%p29_p4, %s1419_s24), 0  ;;  %213 = sbr.rel (%p210_p3) target bundleno = 265 (0x109), region = 40 }
   0xa   : > { %p249_p6 = scmp.lt.s32.totalorder (!%p210_p3), %s995_s25, 27  ;;  %p259_p7 = scmp.lt.s32.totalorder (!%p210_p3), %s1186_s18, 13 }
   0xe   : > { %v1204_v0 = vmov 0   ;;  %s1423_s19 = smov (!%p247_p5, %s1190_s19), 1  ;;  %vm300_vm0 = vcmask 1044480   ;;  %v268_v1 = vld [vmem:[%s1408_s2] sm:$0xf]  ;;  %s1425_s25 = smov (!%p249_p6, %s995_s25), 27 }
   0xf   : > { %342 = vmatprep.mubr.bf16.mxu0 %v1204_v0  ;;  %414 = vmatprep.mubr.bf16.mxu1 %v1204_v0  ;;  %v879_v2 = vld [vmem:[%s1410_s4] sm:$0xf]  ;;  %s1070_s30 = smul.u32 896, %s1423_s19  ;;  %s996_s8 = sshll.u32 %s1425_s25, 5  ;;  %vm301_vm1 = vcmask 1045504   ;;  %v1205_v4 = vmov 65535  }
  0x10   : > { %1114 = vset.pattern.permute.xlu0 %v1204_v0  ;;  %1115 = vset.pattern.permute.xlu1 %v1204_v0  ;;  %v871_v3 = vld [vmem:[%s1409_s3] sm:$0xf]  ;;  %v302_v5 = vsel %vm300_vm0, 4294967295, %v1205_v4  ;;  %vm296_vm2 = vcmask 220160   ;;  %s1427_s18 = smov (!%p259_p7, %s1186_s18), 13  ;;  %s1071_s16 = smul.u32 28, %s1423_s19 }
  0x11   : > { %275 = vperm.xlu0 %1114, %v268_v1   ;;  %882 = vperm.xlu1 %1115, %v879_v2   ;;  %s253_s9 = sadd.s32 %s1070_s30, %s996_s8  ;;  %v1290_v6 = vsel %vm301_vm1, %v302_v5, 0  ;;  %v1311_v23 = vld [vmem:[%s1407_s1] sm:$0x3]  ;;  %s998_s17 = sshll.u32 %s1427_s18, 1  ;;  %vm891_vm3 = vcmask 1043456   ;;  %vm892_vm4 = vcmask 556036  }
  0x12   : > { %s997_s10 = sshll.u32 %s253_s9, 2  ;;  %s263_s25 = sadd.s32 %s1071_s16, %s998_s17  ;;  %vm893_vm5 = vmor %vm892_vm4, %vm891_vm3 }
  0x13   : > { %s1288_s13 = scalar_lea.vmem %s1406_s0, %s997_s10  ;;  %s999_s26 = sshll.u32 %s263_s25, 2 }
  0x14   : > { %v1116_v7 = vld [vmem:[%s1288_s13 + $0x14] ss:$8 sps:$4 sm:$0x3f]   ;;  %v1120_v10 = vld [vmem:[%s1288_s13 + $0x10] ss:$8 sps:$4 sm:$0x3f]   ;;  %s265_s18 = scalar_lea.vmem %s1411_s5, %s999_s26 }
  0x15   : > { %874 = vperm.xlu0 %1114, %v871_v3   ;;  %v1118_v8 = vld [vmem:[%s1288_s13 + $0x34] ss:$8 sps:$4 sm:$0x3f]   ;;  %v308_v9 = vand.u32 %v1116_v7, %v1290_v6  ;;  %v1121_v11 = vld [vmem:[%s1288_s13 + $0x30] ss:$8 sps:$4 sm:$0x3f]   ;;  %v305_v14 = vand.u32 %v1120_v10, %v1290_v6 }
  0x16   : > { %v380_v12 = vand.u32 %v1118_v8, %v1290_v6  ;;  %v1122_v13 = vld [vmem:[%s1288_s13 + $0x4] ss:$8 sps:$4 sm:$0xff]   ;;  %v377_v15 = vand.u32 %v1121_v11, %v1290_v6  ;;  %v1126_v17 = vld [vmem:[%s1288_s13] ss:$8 sps:$4 sm:$0xff]  }
  0x17   : > { %322 = vmatprep.subr.bf16.mxu0 %v308_v9  ;;  %v1124_v16 = vld [vmem:[%s1288_s13 + $0x24] ss:$8 sps:$4 sm:$0xff]   ;;  %v1127_v18 = vld [vmem:[%s1288_s13 + $0x20] ss:$8 sps:$4 sm:$0xff]  }
  0x18   : > { %394 = vmatprep.subr.bf16.mxu1 %v380_v12  ;;  %323 = vmatpush1.bf16.msra.mxu0 %v305_v14  ;;  %v1128_v19 = vld [vmem:[%s1288_s13 + $0x50] ss:$8 sps:$4 sm:$0x3f]   ;;  %v1130_v20 = vld [vmem:[%s1288_s13 + $0x54] ss:$8 sps:$4 sm:$0x3f]  }
  0x19   : > { %395 = vmatpush1.bf16.msra.mxu1 %v377_v15  ;;  %324 = vmatprep.subr.bf16.mxu0 %v1122_v13  ;;  %v1131_v21 = vld [vmem:[%s1288_s13 + $0x70] ss:$8 sps:$4 sm:$0x3f]   ;;  %v1133_v22 = vld [vmem:[%s1288_s13 + $0x74] ss:$8 sps:$4 sm:$0x3f]   ;;  %v454_v24 = vand.u32 %v1130_v20, %v1290_v6  ;;  %v451_v26 = vand.u32 %v1128_v19, %v1290_v6 }
  0x1a   : > { %396 = vmatprep.subr.bf16.mxu1 %v1124_v16  ;;  %v528_v25 = vand.u32 %v1133_v22, %v1290_v6  ;;  %v525_v27 = vand.u32 %v1131_v21, %v1290_v6  ;;  %v1136_v28 = vld [vmem:[%s1288_s13 + $0x44] ss:$8 sps:$4 sm:$0xff]   ;;  %v1134_v30 = vld [vmem:[%s1288_s13 + $0x40] ss:$8 sps:$4 sm:$0xff]  }
  0x1b   : > { %v1139_v29 = vld [vmem:[%s1288_s13 + $0x64] ss:$8 sps:$4 sm:$0xff]   ;;  %v1137_v31 = vld [vmem:[%s1288_s13 + $0x60] ss:$8 sps:$4 sm:$0xff]  }
  0x1c   : > { %325 = vmatpush1.bf16.msra.mxu0 %v1126_v17  ;;  %v1140_v32 = vld [vmem:[%s1288_s13 + $0x90] ss:$8 sps:$4 sm:$0x3f]   ;;  %v1142_v33 = vld [vmem:[%s1288_s13 + $0x94] ss:$8 sps:$4 sm:$0x3f]  }
  0x1d   : > { %397 = vmatpush1.bf16.msra.mxu1 %v1127_v18  ;;  %468 = vmatprep.subr.bf16.mxu0 %v454_v24  ;;  %v1143_v34 = vld [vmem:[%s1288_s13 + $0xb0] ss:$8 sps:$4 sm:$0x3f]   ;;  %v1145_v35 = vld [vmem:[%s1288_s13 + $0xb4] ss:$8 sps:$4 sm:$0x3f]   ;;  %v602_v36 = vand.u32 %v1142_v33, %v1290_v6  ;;  %v599_v39 = vand.u32 %v1140_v32, %v1290_v6 }
  0x1e   : > { %542 = vmatprep.subr.bf16.mxu1 %v528_v25  ;;  %v676_v37 = vand.u32 %v1145_v35, %v1290_v6  ;;  %v1148_v38 = vld [vmem:[%s1288_s13 + $0x84] ss:$8 sps:$4 sm:$0xff]   ;;  %v673_v40 = vand.u32 %v1143_v34, %v1290_v6  ;;  %v1154_v42 = vld [vmem:[%s1288_s13 + $0xd4] ss:$8 sps:$4 sm:$0x3f]  }
  0x1f   : > { %1004 = vmatmul.mubr.msk.bf16.vlgmr.msra.gmra.mxu0 %vm296_vm2, %v1311_v23  ;;  %v1151_v41 = vld [vmem:[%s1288_s13 + $0xa4] ss:$8 sps:$4 sm:$0xff]   ;;  %v1157_v43 = vld [vmem:[%s1288_s13 + $0xf4] ss:$8 sps:$4 sm:$0x3f]   ;;  %v750_v48 = vand.u32 %v1154_v42, %v1290_v6 }
  0x20   : > { %1013 = vmatmul.mubr.msk.bf16.vlgmr.msra.gmra.mxu1 %vm296_vm2, %v1311_v23  ;;  %469 = vmatpush1.bf16.msra.mxu0 %v451_v26  ;;  %v1146_v44 = vld [vmem:[%s1288_s13 + $0x80] ss:$8 sps:$4 sm:$0xff]   ;;  %v1152_v46 = vld [vmem:[%s1288_s13 + $0xd0] ss:$8 sps:$4 sm:$0x3f]   ;;  %v824_v49 = vand.u32 %v1157_v43, %v1290_v6 }
  0x21   : > { %543 = vmatpush1.bf16.msra.mxu1 %v525_v27  ;;  %470 = vmatprep.subr.bf16.mxu0 %v1136_v28  ;;  %v1149_v45 = vld [vmem:[%s1288_s13 + $0xa0] ss:$8 sps:$4 sm:$0xff]   ;;  %v1155_v47 = vld [vmem:[%s1288_s13 + $0xf0] ss:$8 sps:$4 sm:$0x3f]   ;;  %v747_v50 = vand.u32 %v1152_v46, %v1290_v6 }
  0x22   : > { %544 = vmatprep.subr.bf16.mxu1 %v1139_v29  ;;  %488 = vmatprep.mubr.bf16.mxu0 %v1204_v0  ;;  %v821_v51 = vand.u32 %v1155_v47, %v1290_v6  ;;  %v1160_v52 = vld [vmem:[%s1288_s13 + $0xc4] ss:$8 sps:$4 sm:$0xff]   ;;  %v1158_v54 = vld [vmem:[%s1288_s13 + $0xc0] ss:$8 sps:$4 sm:$0xff]  }
  0x23   : > { %562 = vmatprep.mubr.bf16.mxu1 %v1204_v0  ;;  %v1163_v53 = vld [vmem:[%s1288_s13 + $0xe4] ss:$8 sps:$4 sm:$0xff]   ;;  %v1161_v55 = vld [vmem:[%s1288_s13 + $0xe0] ss:$8 sps:$4 sm:$0xff]  }
  0x24   : > { %471 = vmatpush1.bf16.msra.mxu0 %v1134_v30 }
  0x25   : > { %545 = vmatpush1.bf16.msra.mxu1 %v1137_v31  ;;  %616 = vmatprep.subr.bf16.mxu0 %v602_v36 }
  0x26   : > { %690 = vmatprep.subr.bf16.mxu1 %v676_v37 }
  0x27   : > { %1022 = vmatmul.mubr.msk.bf16.vlgmr.msra.gmra.mxu0 %vm296_vm2, %v1311_v23 }
  0x28   : > { %1031 = vmatmul.mubr.msk.bf16.vlgmr.msra.gmra.mxu1 %vm296_vm2, %v1311_v23  ;;  %617 = vmatpush1.bf16.msra.mxu0 %v599_v39 }
  0x29   : > { %691 = vmatpush1.bf16.msra.mxu1 %v673_v40  ;;  %618 = vmatprep.subr.bf16.mxu0 %v1148_v38 }
  0x2a   : > { %692 = vmatprep.subr.bf16.mxu1 %v1151_v41  ;;  %636 = vmatprep.mubr.bf16.mxu0 %v1204_v0 }
  0x2b   : > { %710 = vmatprep.mubr.bf16.mxu1 %v1204_v0 }
  0x2c   : > { %619 = vmatpush1.bf16.msra.mxu0 %v1146_v44 }
  0x2d   : > { %693 = vmatpush1.bf16.msra.mxu1 %v1149_v45  ;;  %764 = vmatprep.subr.bf16.mxu0 %v750_v48 }
  0x2e   : > { %838 = vmatprep.subr.bf16.mxu1 %v824_v49 }
  0x2f   : > { %1040 = vmatmul.mubr.msk.bf16.vlgmr.msra.gmra.mxu0 %vm296_vm2, %v1311_v23 }
  0x30   : > { %1049 = vmatmul.mubr.msk.bf16.vlgmr.msra.gmra.mxu1 %vm296_vm2, %v1311_v23  ;;  %765 = vmatpush1.bf16.msra.mxu0 %v747_v50 }
  0x31   : > { %839 = vmatpush1.bf16.msra.mxu1 %v821_v51  ;;  %766 = vmatprep.subr.bf16.mxu0 %v1160_v52 }
  0x32   : > { %840 = vmatprep.subr.bf16.mxu1 %v1163_v53  ;;  %784 = vmatprep.mubr.bf16.mxu0 %v1204_v0 }
  0x33   : > { %858 = vmatprep.mubr.bf16.mxu1 %v1204_v0 }
  0x34   : > { %767 = vmatpush1.bf16.msra.mxu0 %v1158_v54 }
  0x35   : > { %841 = vmatpush1.bf16.msra.mxu1 %v1161_v55 }
  0x37   : > { %1058 = vmatmul.mubr.msk.bf16.vlgmr.msra.gmra.mxu0 %vm296_vm2, %v1311_v23 }
  0x38   : > { %1067 = vmatmul.mubr.msk.bf16.vlgmr.msra.gmra.mxu1 %vm296_vm2, %v1311_v23 }
  0x8c   : > { %v1367_v60 = vpop.permute.xlu0 %275 }
  0xdf   : > { %v344_v56 = vpop.f32.mrf.mxu0 }
  0xe0   : > { %v416_v57 = vpop.f32.mrf.mxu1  ;;  %v345_v0 = vadd.f32 %v344_v56, %v1367_v60 }
  0xe1   : > { %v346_v58 = vpop.f32.mrf.mxu0  ;;  %v417_v2 = vadd.f32 %v416_v57, %v1367_v60 }
  0xe2   : > { %v418_v59 = vpop.f32.mrf.mxu1  ;;  %v347_v3 = vadd.f32 %v346_v58, %v1367_v60  ;;  %v351_v10 = vmax.f32 %v345_v0, 0.0 }
  0xe3   : > { %v348_v61 = vpop.f32.mrf.mxu0  ;;  %v419_v4 = vadd.f32 %v418_v59, %v1367_v60  ;;  %v423_v11 = vmax.f32 %v417_v2, 0.0 }
  0xe4   : > { %v420_v62 = vpop.f32.mrf.mxu1  ;;  %v352_v13 = vmax.f32 %v347_v3, 0.0 }
  0xe5   : > { %v349_v63 = vpop.f32.mrf.mxu0  ;;  %v424_v14 = vmax.f32 %v419_v4, 0.0  ;;  %v425_v21 = vmax.f32 %v351_v10, %v423_v11  ;;  %v883_v10 = vpop.permute.xlu1 %882 }
  0xe6   : > { %v421_v1 = vpop.f32.mrf.mxu1 }
  0xe7   : > { %v490_v5 = vpop.f32.mrf.mxu0  ;;  %v426_v23 = vmax.f32 %v352_v13, %v424_v14 }
  0xe8   : > { %v564_v6 = vpop.f32.mrf.mxu1  ;;  %v491_v7 = vadd.f32 %v490_v5, %v1367_v60 }
  0xe9   : > { %v492_v8 = vpop.f32.mrf.mxu0  ;;  %v565_v18 = vadd.f32 %v564_v6, %v1367_v60 }
  0xea   : > { %v566_v9 = vpop.f32.mrf.mxu1  ;;  %v493_v12 = vadd.f32 %v492_v8, %v1367_v60  ;;  %v497_v17 = vmax.f32 %v491_v7, 0.0  ;;  %v875_v7 = vpop.permute.xlu0 %874 }
  0xeb   : > { %v494_v15 = vpop.f32.mrf.mxu0  ;;  %v571_v27 = vmax.f32 %v565_v18, 0.0  ;;  %v567_v28 = vadd.f32 %v566_v9, %v1367_v60 }
  0xec   : > { %v568_v16 = vpop.f32.mrf.mxu1  ;;  %v498_v22 = vmax.f32 %v493_v12, 0.0  ;;  %v499_v26 = vmax.f32 %v425_v21, %v497_v17 }
  0xed   : > { %v495_v19 = vpop.f32.mrf.mxu0  ;;  %v572_v38 = vmax.f32 %v567_v28, 0.0 }
  0xee   : > { %v569_v20 = vpop.f32.mrf.mxu1  ;;  %v500_v32 = vmax.f32 %v426_v23, %v498_v22  ;;  %v573_v37 = vmax.f32 %v499_v26, %v571_v27 }
  0xef   : > { %v638_v24 = vpop.f32.mrf.mxu0 }
  0xf0   : > { %v712_v25 = vpop.f32.mrf.mxu1  ;;  %v639_v29 = vadd.f32 %v638_v24, %v1367_v60  ;;  %v574_v44 = vmax.f32 %v500_v32, %v572_v38 }
  0xf1   : > { %v640_v30 = vpop.f32.mrf.mxu0  ;;  %v713_v39 = vadd.f32 %v712_v25, %v1367_v60 }
  0xf2   : > { %v714_v31 = vpop.f32.mrf.mxu1  ;;  %v645_v33 = vmax.f32 %v639_v29, 0.0  ;;  %v641_v34 = vadd.f32 %v640_v30, %v1367_v60 }
  0xf3   : > { %v642_v35 = vpop.f32.mrf.mxu0  ;;  %v715_v41 = vadd.f32 %v714_v31, %v1367_v60  ;;  %v719_v48 = vmax.f32 %v713_v39, 0.0 }
  0xf4   : > { %v716_v36 = vpop.f32.mrf.mxu1  ;;  %v646_v40 = vmax.f32 %v641_v34, 0.0  ;;  %v647_v45 = vmax.f32 %v573_v37, %v645_v33 }
  0xf5   : > { %v643_v42 = vpop.f32.mrf.mxu0  ;;  %v720_v52 = vmax.f32 %v715_v41, 0.0 }
  0xf6   : > { %v717_v43 = vpop.f32.mrf.mxu1  ;;  %v648_v49 = vmax.f32 %v574_v44, %v646_v40  ;;  %v721_v55 = vmax.f32 %v647_v45, %v719_v48 }
  0xf7   : > { %v786_v46 = vpop.f32.mrf.mxu0 }
  0xf8   : > { %v860_v47 = vpop.f32.mrf.mxu1  ;;  %v787_v50 = vadd.f32 %v786_v46, %v1367_v60  ;;  %v722_v62 = vmax.f32 %v648_v49, %v720_v52 }
  0xf9   : > { %v861_v51 = vadd.f32 %v860_v47, %v1367_v60  ;;  %v788_v53 = vpop.f32.mrf.mxu0 }
  0xfa   : > { %v862_v54 = vpop.f32.mrf.mxu1  ;;  %v793_v56 = vmax.f32 %v787_v50, 0.0  ;;  %v789_v57 = vadd.f32 %v788_v53, %v1367_v60 }
  0xfb   : > { %v863_v58 = vadd.f32 %v862_v54, %v1367_v60  ;;  %v790_v59 = vpop.f32.mrf.mxu0  ;;  %v867_v1 = vmax.f32 %v861_v51, 0.0 }
  0xfc   : > { %v864_v61 = vpop.f32.mrf.mxu1  ;;  %v795_v63 = vmax.f32 %v721_v55, %v793_v56  ;;  %v794_v0 = vmax.f32 %v789_v57, 0.0 }
  0xfd   : > { %v791_v2 = vpop.f32.mrf.mxu0  ;;  %v868_v6 = vmax.f32 %v863_v58, 0.0 }
  0xfe   : > { %v865_v3 = vpop.f32.mrf.mxu1  ;;  %v869_v4 = vmax.f32 %v795_v63, %v867_v1  ;;  %v796_v5 = vmax.f32 %v722_v62, %v794_v0 }
 0x100   : > { %v870_v8 = vmax.f32 %v796_v5, %v868_v6  ;;  %v877_v9 = vmul.f32 %v875_v7, %v869_v4 }
 0x102   : > { %v878_v60 = vmul.f32 %v875_v7, %v870_v8  ;;  %v885_v11 = vadd.f32 %v883_v10, %v877_v9 }
 0x104   : > { %v886_v12 = vadd.f32 %v883_v10, %v878_v60 }
 0x106   : > { %v889_v13 = vcombine.low %v885_v11, %v886_v12 }
 0x108   : > { %894 = vst.msk [vmem:[%s265_s18] sm:$0xff] %vm893_vm5, %v889_v13 }
 0x109 PF: > { %s15_s22 = sadd.s32 1, %s1202_s22   ;;  %s1412_s18 = smov %s1194_s20 }
 0x10a   : > { %p12_p8 = scmp.ge.s32.totalorder %s15_s22, 30   ;;  %s1413_s19 = smov %s1198_s21 }
 0x10b   : > { %s1414_s20 = smov %s1417_s23  ;;  %s1415_s21 = smov %s1421_s24 }
 0x10c   :  { %14 = sbr.rel (!%p12_p8) target bundleno = 3 (0x3), region = 77 }

// kernel: cnn3d3_forward.5
= control target key start
LH: loop header
LB: loop body
LE: loop exit
PB: predicated region body
PF: predicated region fallthrough
CT: control target
= control target key end

     0   :  { %s1745_s18 = smov 0   ;;  %s1747_s19 = smov 0   ;;  %s1979_s0 = inlined_call_operand.vmem [shape: bf16[2,12,4,108,36], index: 0, kind: input, shape index: {}]   ;;  %s1980_s1 = inlined_call_operand.vmem [shape: bf16[8,108], index: 1, kind: input, shape index: {}]   ;;  %s1981_s2 = inlined_call_operand.vmem [shape: f32[8,1], index: 2, kind: input, shape index: {}]   ;;  %s1982_s3 = inlined_call_operand.vmem [shape: f32[8,1], index: 3, kind: input, shape index: {}]   ;;  %s1983_s4 = inlined_call_operand.vmem [shape: f32[8,1], index: 4, kind: input, shape index: {}]   ;;  %s1984_s5 = inlined_call_operand.vmem [shape: f32[2,6,8,36], index: 5, kind: output, shape index: {}]  }
   0x1   :  { %s1749_s20 = smov 0   ;;  %s1751_s21 = smov 0  }
   0x2   :  { %s1753_s22 = smov 0  }
   0x3 LB: > { %s24_s23 = sadd.s32 1, %s1702_s20  ;;  %s27_s24 = sadd.s32 1, %s1706_s21  ;;  %s1710_s22 = sphi %s1753_s22, %s15_s22   ;;  %s1706_s21 = sphi %s1751_s21, %s1988_s21   ;;  %s1702_s20 = sphi %s1749_s20, %s1987_s20   ;;  %s1698_s19 = sphi %s1747_s19, %s1986_s19   ;;  %s1694_s18 = sphi %s1745_s18, %s1985_s18  }
   0x4   : > { %p25_p0 = scmp.ge.s32.totalorder %s24_s23, 6  ;;  %p1192_p1 = scmp.ge.s32.totalorder %s1710_s22, 1 }
   0x5   : > { %p209_p2 = scmp.lt.s32.totalorder %s1710_s22, 13 }
   0x6   : > { %s1990_s23 = smov (%p25_p0, %s24_s23), 0  ;;  %s1992_s24 = smov (!%p25_p0, %s27_s24), %s1706_s21 }
   0x7   : > { %p210_p3 = pnand %p1192_p1, %p209_p2  ;;  %p29_p4 = scmp.ge.s32.totalorder %s1992_s24, 2 }
   0x8   : > { %s1193_s25 = sshll.u32 (!%p210_p3), %s1694_s18, 1  ;;  %p246_p5 = scmp.lt.s32.totalorder (!%p210_p3), %s1698_s19, 1 }
   0x9   : > { %s1994_s24 = smov (%p29_p4, %s1992_s24), 0  ;;  %213 = sbr.rel (%p210_p3) target bundleno = 340 (0x154), region = 40 }
   0xa   : > { %p248_p6 = scmp.lt.s32.totalorder (!%p210_p3), %s1193_s25, 11  ;;  %p258_p7 = scmp.lt.s32.totalorder (!%p210_p3), %s1694_s18, 5 }
   0xe   : > { %v1712_v0 = vmov 0.0   ;;  %v266_v1 = vld [vmem:[%s1981_s2] sm:$0xff]  ;;  %s1996_s19 = smov (!%p246_p5, %s1698_s19), 1  ;;  %vm1713_vm0 = vmmov 0   ;;  %s1998_s25 = smov (!%p248_p6, %s1193_s25), 11  ;;  %v1714_v3 = vmov 0  }
   0xf   : > { %1424 = vmatprep.subr.bf16.mxu0 %v1712_v0  ;;  %1442 = vmatprep.subr.bf16.mxu1 %v1712_v0  ;;  %v1090_v2 = vld [vmem:[%s1983_s4] sm:$0xff]  ;;  %s1569_s30 = smul.u32 672, %s1996_s19  ;;  %vm331_vm1 = vcmask 1045504   ;;  %vm327_vm2 = vcmask 883712   ;;  %s2000_s18 = smov (!%p258_p7, %s1694_s18), 5  ;;  %vm1097_vm3 = vcmask 293888  }
  0x10   : > { %1438 = vmatprep.mubr.msk.bf16.mxu0 %vm1713_vm0, %v1712_v0  ;;  %1456 = vmatprep.mubr.msk.bf16.mxu1 %vm1713_vm0, %v1712_v0  ;;  %s1568_s6 = smul.u32 56, %s1998_s25  ;;  %v1083_v4 = vld [vmem:[%s1982_s3] sm:$0xff] }
  0x11   : > { %1614 = vset.pattern.permute.xlu0 %v1714_v3  ;;  %1615 = vset.pattern.permute.xlu1 %v1714_v3  ;;  %v1834_v23 = vld [vmem:[%s1980_s1] sm:$0xf]  ;;  %s1570_s16 = smul.u32 6, %s1996_s19 }
  0x12   : > { %283 = vperm.xlu0 %1614, %v266_v1   ;;  %1093 = vperm.xlu1 %1615, %v1090_v2   ;;  %s252_s9 = sadd.s32 %s1569_s30, %s1568_s6 }
  0x13   : > { %s1194_s10 = sshll.u32 %s252_s9, 2  ;;  %s261_s17 = sadd.s32 %s1570_s16, %s2000_s18 }
  0x14   : > { %s1799_s13 = scalar_lea.vmem %s1979_s0, %s1194_s10  ;;  %s1195_s25 = sshll.u32 %s261_s17, 3 }
  0x15   : > { %v1616_v5 = vld [vmem:[%s1799_s13 + $0x30] sm:$0x3f]   ;;  %v1617_v6 = vld [vmem:[%s1799_s13 + $0x68] sm:$0x3f]   ;;  %v1619_v10 = vld [vmem:[%s1799_s13 + $0x60] sm:$0xff]   ;;  %s263_s27 = scalar_lea.vmem %s1984_s5, %s1195_s25 }
  0x16   : > { %1086 = vperm.xlu0 %1614, %v1083_v4   ;;  %v333_v7 = vsel %vm331_vm1, %v1616_v5, 0  ;;  %v433_v8 = vsel %vm331_vm1, %v1617_v6, 0  ;;  %v1618_v9 = vld [vmem:[%s1799_s13 + $0x28] sm:$0xff]   ;;  %v1620_v11 = vld [vmem:[%s1799_s13 + $0x20] sm:$0xff]   ;;  %v1621_v12 = vld [vmem:[%s1799_s13 + $0x58] sm:$0xff]  }
  0x17   : > { %1425 = vmatpush3.bf16.msra.mxu0 %v333_v7  ;;  %1443 = vmatpush3.bf16.msra.mxu1 %v433_v8  ;;  %v1622_v13 = vld [vmem:[%s1799_s13 + $0x18] sm:$0xff]   ;;  %v1623_v14 = vld [vmem:[%s1799_s13 + $0x50] sm:$0xff]   ;;  %v1625_v16 = vld [vmem:[%s1799_s13 + $0x48] sm:$0xff]  }
  0x18   : > { %1426 = vmatprep.subr.bf16.mxu0 %v1712_v0  ;;  %1444 = vmatprep.subr.bf16.mxu1 %v1712_v0  ;;  %v1624_v15 = vld [vmem:[%s1799_s13 + $0x10] sm:$0xff]   ;;  %v1626_v17 = vld [vmem:[%s1799_s13 + $0x8] sm:$0xff]   ;;  %v1627_v18 = vld [vmem:[%s1799_s13 + $0x40] sm:$0xff]  }
  0x19   : > { %v1628_v19 = vld [vmem:[%s1799_s13] sm:$0xff]   ;;  %v1629_v20 = vld [vmem:[%s1799_s13 + $0x38] sm:$0xff]   ;;  %v1633_v27 = vld [vmem:[%s1799_s13 + $0xd0] sm:$0xff]  }
  0x1a   : > { %v1630_v21 = vld [vmem:[%s1799_s13 + $0xa0] sm:$0x3f]   ;;  %v1631_v22 = vld [vmem:[%s1799_s13 + $0xd8] sm:$0x3f]   ;;  %v1634_v28 = vld [vmem:[%s1799_s13 + $0x90] sm:$0xff]  }
  0x1b   : > { %1427 = vmatpush3.bf16.msra.mxu0 %v1618_v9  ;;  %1445 = vmatpush3.bf16.msra.mxu1 %v1619_v10  ;;  %v534_v24 = vsel %vm331_vm1, %v1630_v21, 0  ;;  %v635_v25 = vsel %vm331_vm1, %v1631_v22, 0  ;;  %v1632_v26 = vld [vmem:[%s1799_s13 + $0x98] sm:$0xff]   ;;  %v1635_v29 = vld [vmem:[%s1799_s13 + $0xc8] sm:$0xff]   ;;  %v1637_v31 = vld [vmem:[%s1799_s13 + $0xc0] sm:$0xff]  }
  0x1c   : > { %1428 = vmatprep.subr.bf16.mxu0 %v1712_v0  ;;  %1446 = vmatprep.subr.bf16.mxu1 %v1712_v0  ;;  %v1636_v30 = vld [vmem:[%s1799_s13 + $0x88] sm:$0xff]   ;;  %v1638_v32 = vld [vmem:[%s1799_s13 + $0x80] sm:$0xff]   ;;  %v1659_v34 = vld [vmem:[%s1799_s13 + $0x1b8] sm:$0x3f]  }
  0x1d   : > { %v1658_v33 = vld [vmem:[%s1799_s13 + $0x180] sm:$0x3f]   ;;  %v1639_v35 = vld [vmem:[%s1799_s13 + $0xb8] sm:$0xff]   ;;  %v1870_v37 = vsel %vm331_vm1, %v1659_v34, 0  ;;  %v1641_v39 = vld [vmem:[%s1799_s13 + $0xb0] sm:$0xff]  }
  0x1e   : > { %v1866_v36 = vsel %vm331_vm1, %v1658_v33, 0  ;;  %v1640_v38 = vld [vmem:[%s1799_s13 + $0x78] sm:$0xff]   ;;  %v1642_v40 = vld [vmem:[%s1799_s13 + $0x70] sm:$0xff]   ;;  %v1643_v41 = vld [vmem:[%s1799_s13 + $0xa8] sm:$0xff]  }
  0x1f   : > { %1429 = vmatpush3.bf16.msra.mxu0 %v1620_v11  ;;  %1447 = vmatpush3.bf16.msra.mxu1 %v1621_v12  ;;  %v1644_v42 = vld [vmem:[%s1799_s13 + $0x110] sm:$0x3f]   ;;  %v1645_v43 = vld [vmem:[%s1799_s13 + $0x148] sm:$0x3f]   ;;  %v1647_v47 = vld [vmem:[%s1799_s13 + $0x140] sm:$0xff]  }
  0x20   : > { %1430 = vmatprep.subr.bf16.mxu0 %v1712_v0  ;;  %1448 = vmatprep.subr.bf16.mxu1 %v1712_v0  ;;  %v736_v44 = vsel %vm331_vm1, %v1644_v42, 0  ;;  %v837_v45 = vsel %vm331_vm1, %v1645_v43, 0  ;;  %v1646_v46 = vld [vmem:[%s1799_s13 + $0x108] sm:$0xff]   ;;  %v1648_v48 = vld [vmem:[%s1799_s13 + $0x100] sm:$0xff]   ;;  %v1649_v49 = vld [vmem:[%s1799_s13 + $0x138] sm:$0xff]  }
  0x21   : > { %v1650_v50 = vld [vmem:[%s1799_s13 + $0xf8] sm:$0xff]   ;;  %v1651_v51 = vld [vmem:[%s1799_s13 + $0x130] sm:$0xff]   ;;  %v1653_v53 = vld [vmem:[%s1799_s13 + $0x128] sm:$0xff]  }
  0x22   : > { %v1652_v52 = vld [vmem:[%s1799_s13 + $0xf0] sm:$0xff]   ;;  %v1654_v54 = vld [vmem:[%s1799_s13 + $0xe8] sm:$0xff]   ;;  %v1655_v55 = vld [vmem:[%s1799_s13 + $0x120] sm:$0xff]  }
  0x23   : > { %1431 = vmatpush3.bf16.msra.mxu0 %v1622_v13  ;;  %1449 = vmatpush3.bf16.msra.mxu1 %v1623_v14  ;;  %v1656_v56 = vld [vmem:[%s1799_s13 + $0xe0] sm:$0xff]   ;;  %v1657_v57 = vld [vmem:[%s1799_s13 + $0x118] sm:$0xff]   ;;  %v1661_v59 = vld [vmem:[%s1799_s13 + $0x1b0] sm:$0xff]  }
  0x24   : > { %1432 = vmatprep.subr.bf16.mxu0 %v1712_v0  ;;  %1450 = vmatprep.subr.bf16.mxu1 %v1712_v0  ;;  %v1660_v58 = vld [vmem:[%s1799_s13 + $0x178] sm:$0xff]   ;;  %v1662_v60 = vld [vmem:[%s1799_s13 + $0x170] sm:$0xff]   ;;  %v1663_v61 = vld [vmem:[%s1799_s13 + $0x1a8] sm:$0xff]  }
  0x25   : > { %v1664_v62 = vld [vmem:[%s1799_s13 + $0x168] sm:$0xff]   ;;  %v1665_v63 = vld [vmem:[%s1799_s13 + $0x1a0] sm:$0xff]   ;;  %v1667_v2 = vld [vmem:[%s1799_s13 + $0x198] sm:$0xff]  }
  0x26   : > { %v1666_v1 = vld [vmem:[%s1799_s13 + $0x160] sm:$0xff]   ;;  %v1668_v3 = vld [vmem:[%s1799_s13 + $0x158] sm:$0xff]   ;;  %v1669_v4 = vld [vmem:[%s1799_s13 + $0x190] sm:$0xff]  }
  0x27   : > { %1433 = vmatpush3.bf16.msra.mxu0 %v1624_v15  ;;  %1451 = vmatpush3.bf16.msra.mxu1 %v1625_v16  ;;  %v1670_v5 = vld [vmem:[%s1799_s13 + $0x150] sm:$0xff]   ;;  %v1671_v6 = vld [vmem:[%s1799_s13 + $0x188] sm:$0xff]  }
  0x28   : > { %1434 = vmatprep.subr.bf16.mxu0 %v1712_v0  ;;  %1452 = vmatprep.subr.bf16.mxu1 %v1712_v0 }
  0x2b   : > { %1435 = vmatpush3.bf16.msra.mxu0 %v1626_v17  ;;  %1453 = vmatpush3.bf16.msra.mxu1 %v1627_v18 }
  0x2c   : > { %1436 = vmatprep.subr.bf16.mxu0 %v1712_v0  ;;  %1454 = vmatprep.subr.bf16.mxu1 %v1712_v0 }
  0x2f   : > { %1437 = vmatpush3.bf16.msra.mxu0 %v1628_v19  ;;  %1455 = vmatpush3.bf16.msra.mxu1 %v1629_v20 }
  0x30   : > { %1460 = vmatprep.subr.bf16.mxu0 %v1712_v0  ;;  %1478 = vmatprep.subr.bf16.mxu1 %v1712_v0 }
  0x32   : > { %1439 = vmatmul.mubr.msk.bf16.vlgmr.msra.gmra.mxu0 %vm327_vm2, %v1834_v23  ;;  %1457 = vmatmul.mubr.msk.bf16.vlgmr.msra.gmra.mxu1 %vm327_vm2, %v1834_v23 }
  0x33   : > { %1461 = vmatpush3.bf16.msra.mxu0 %v534_v24  ;;  %1479 = vmatpush3.bf16.msra.mxu1 %v635_v25 }
  0x34   : > { %1462 = vmatprep.subr.bf16.mxu0 %v1712_v0  ;;  %1480 = vmatprep.subr.bf16.mxu1 %v1712_v0 }
  0x35   : > { %1474 = vmatprep.mubr.msk.bf16.mxu0 %vm1713_vm0, %v1712_v0  ;;  %1492 = vmatprep.mubr.msk.bf16.mxu1 %vm1713_vm0, %v1712_v0 }
  0x37   : > { %1463 = vmatpush3.bf16.msra.mxu0 %v1632_v26  ;;  %1481 = vmatpush3.bf16.msra.mxu1 %v1633_v27 }
  0x38   : > { %1464 = vmatprep.subr.bf16.mxu0 %v1712_v0  ;;  %1482 = vmatprep.subr.bf16.mxu1 %v1712_v0 }
  0x3b   : > { %1465 = vmatpush3.bf16.msra.mxu0 %v1634_v28  ;;  %1483 = vmatpush3.bf16.msra.mxu1 %v1635_v29 }
  0x3c   : > { %1466 = vmatprep.subr.bf16.mxu0 %v1712_v0  ;;  %1484 = vmatprep.subr.bf16.mxu1 %v1712_v0 }
  0x3f   : > { %1467 = vmatpush3.bf16.msra.mxu0 %v1636_v30  ;;  %1485 = vmatpush3.bf16.msra.mxu1 %v1637_v31 }
  0x40   : > { %1468 = vmatprep.subr.bf16.mxu0 %v1712_v0  ;;  %1486 = vmatprep.subr.bf16.mxu1 %v1712_v0 }
  0x43   : > { %1469 = vmatpush3.bf16.msra.mxu0 %v1638_v32  ;;  %1487 = vmatpush3.bf16.msra.mxu1 %v1639_v35 }
  0x44   : > { %1470 = vmatprep.subr.bf16.mxu0 %v1712_v0  ;;  %1488 = vmatprep.subr.bf16.mxu1 %v1712_v0 }
  0x47   : > { %1471 = vmatpush3.bf16.msra.mxu0 %v1640_v38  ;;  %1489 = vmatpush3.bf16.msra.mxu1 %v1641_v39 }
  0x48   : > { %1472 = vmatprep.subr.bf16.mxu0 %v1712_v0  ;;  %1490 = vmatprep.subr.bf16.mxu1 %v1712_v0 }
  0x4b   : > { %1473 = vmatpush3.bf16.msra.mxu0 %v1642_v40  ;;  %1491 = vmatpush3.bf16.msra.mxu1 %v1643_v41 }
  0x4c   : > { %1496 = vmatprep.subr.bf16.mxu0 %v1712_v0  ;;  %1514 = vmatprep.subr.bf16.mxu1 %v1712_v0 }
  0x4e   : > { %1475 = vmatmul.mubr.msk.bf16.vlgmr.msra.gmra.mxu0 %vm327_vm2, %v1834_v23  ;;  %1493 = vmatmul.mubr.msk.bf16.vlgmr.msra.gmra.mxu1 %vm327_vm2, %v1834_v23 }
  0x4f   : > { %1497 = vmatpush3.bf16.msra.mxu0 %v736_v44  ;;  %1515 = vmatpush3.bf16.msra.mxu1 %v837_v45 }
  0x50   : > { %1498 = vmatprep.subr.bf16.mxu0 %v1712_v0  ;;  %1516 = vmatprep.subr.bf16.mxu1 %v1712_v0 }
  0x51   : > { %1510 = vmatprep.mubr.msk.bf16.mxu0 %vm1713_vm0, %v1712_v0  ;;  %1528 = vmatprep.mubr.msk.bf16.mxu1 %vm1713_vm0, %v1712_v0 }
  0x53   : > { %1499 = vmatpush3.bf16.msra.mxu0 %v1646_v46  ;;  %1517 = vmatpush3.bf16.msra.mxu1 %v1647_v47 }
  0x54   : > { %1500 = vmatprep.subr.bf16.mxu0 %v1712_v0  ;;  %1518 = vmatprep.subr.bf16.mxu1 %v1712_v0 }
  0x57   : > { %1501 = vmatpush3.bf16.msra.mxu0 %v1648_v48  ;;  %1519 = vmatpush3.bf16.msra.mxu1 %v1649_v49 }
  0x58   : > { %1502 = vmatprep.subr.bf16.mxu0 %v1712_v0  ;;  %1520 = vmatprep.subr.bf16.mxu1 %v1712_v0 }
  0x5b   : > { %1503 = vmatpush3.bf16.msra.mxu0 %v1650_v50  ;;  %1521 = vmatpush3.bf16.msra.mxu1 %v1651_v51 }
  0x5c   : > { %1504 = vmatprep.subr.bf16.mxu0 %v1712_v0  ;;  %1522 = vmatprep.subr.bf16.mxu1 %v1712_v0 }
  0x5f   : > { %1505 = vmatpush3.bf16.msra.mxu0 %v1652_v52  ;;  %1523 = vmatpush3.bf16.msra.mxu1 %v1653_v53 }
  0x60   : > { %1506 = vmatprep.subr.bf16.mxu0 %v1712_v0  ;;  %1524 = vmatprep.subr.bf16.mxu1 %v1712_v0 }
  0x63   : > { %1507 = vmatpush3.bf16.msra.mxu0 %v1654_v54  ;;  %1525 = vmatpush3.bf16.msra.mxu1 %v1655_v55 }
  0x64   : > { %1508 = vmatprep.subr.bf16.mxu0 %v1712_v0  ;;  %1526 = vmatprep.subr.bf16.mxu1 %v1712_v0 }
  0x67   : > { %1509 = vmatpush3.bf16.msra.mxu0 %v1656_v56  ;;  %1527 = vmatpush3.bf16.msra.mxu1 %v1657_v57 }
  0x68   : > { %1532 = vmatprep.subr.bf16.mxu0 %v1712_v0  ;;  %1550 = vmatprep.subr.bf16.mxu1 %v1712_v0 }
  0x6a   : > { %1511 = vmatmul.mubr.msk.bf16.vlgmr.msra.gmra.mxu0 %vm327_vm2, %v1834_v23  ;;  %1529 = vmatmul.mubr.msk.bf16.vlgmr.msra.gmra.mxu1 %vm327_vm2, %v1834_v23 }
  0x6b   : > { %1533 = vmatpush3.bf16.msra.mxu0 %v1866_v36  ;;  %1551 = vmatpush3.bf16.msra.mxu1 %v1870_v37 }
  0x6c   : > { %1534 = vmatprep.subr.bf16.mxu0 %v1712_v0  ;;  %1552 = vmatprep.subr.bf16.mxu1 %v1712_v0 }
  0x6d   : > { %1546 = vmatprep.mubr.msk.bf16.mxu0 %vm1713_vm0, %v1712_v0  ;;  %1564 = vmatprep.mubr.msk.bf16.mxu1 %vm1713_vm0, %v1712_v0 }
  0x6f   : > { %1535 = vmatpush3.bf16.msra.mxu0 %v1660_v58  ;;  %1553 = vmatpush3.bf16.msra.mxu1 %v1661_v59 }
  0x70   : > { %1536 = vmatprep.subr.bf16.mxu0 %v1712_v0  ;;  %1554 = vmatprep.subr.bf16.mxu1 %v1712_v0 }
  0x73   : > { %1537 = vmatpush3.bf16.msra.mxu0 %v1662_v60  ;;  %1555 = vmatpush3.bf16.msra.mxu1 %v1663_v61 }
  0x74   : > { %1538 = vmatprep.subr.bf16.mxu0 %v1712_v0  ;;  %1556 = vmatprep.subr.bf16.mxu1 %v1712_v0 }
  0x77   : > { %1539 = vmatpush3.bf16.msra.mxu0 %v1664_v62  ;;  %1557 = vmatpush3.bf16.msra.mxu1 %v1665_v63 }
  0x78   : > { %1540 = vmatprep.subr.bf16.mxu0 %v1712_v0  ;;  %1558 = vmatprep.subr.bf16.mxu1 %v1712_v0 }
  0x7b   : > { %1541 = vmatpush3.bf16.msra.mxu0 %v1666_v1  ;;  %1559 = vmatpush3.bf16.msra.mxu1 %v1667_v2 }
  0x7c   : > { %1542 = vmatprep.subr.bf16.mxu0 %v1712_v0  ;;  %1560 = vmatprep.subr.bf16.mxu1 %v1712_v0 }
  0x7f   : > { %1543 = vmatpush3.bf16.msra.mxu0 %v1668_v3  ;;  %1561 = vmatpush3.bf16.msra.mxu1 %v1669_v4 }
  0x80   : > { %1544 = vmatprep.subr.bf16.mxu0 %v1712_v0  ;;  %1562 = vmatprep.subr.bf16.mxu1 %v1712_v0 }
  0x83   : > { %1545 = vmatpush3.bf16.msra.mxu0 %v1670_v5  ;;  %1563 = vmatpush3.bf16.msra.mxu1 %v1671_v6 }
  0x86   : > { %1547 = vmatmul.mubr.msk.bf16.vlgmr.msra.gmra.mxu0 %vm327_vm2, %v1834_v23  ;;  %1565 = vmatmul.mubr.msk.bf16.vlgmr.msra.gmra.mxu1 %vm327_vm2, %v1834_v23 }
  0x8d   : > { %v284_v7 = vpop.permute.xlu0 %283  ;;  %v1094_v63 = vpop.permute.xlu1 %1093 }
  0x91   : > { %v1087_v62 = vpop.permute.xlu0 %1086 }
  0xf2   : > { %v369_v8 = vpop.f32.mrf.mxu0  ;;  %v469_v9 = vpop.f32.mrf.mxu1 }
  0xf3   : > { %v370_v10 = vadd.f32 %v369_v8, %v284_v7  ;;  %v470_v12 = vadd.f32 %v469_v9, %v284_v7 }
  0xf4   : > { %v1440_v11 = vpop.f32.mrf.mxu0  ;;  %v1458_v13 = vpop.f32.mrf.mxu1 }
  0xf5   : > { %v375_v14 = vmax.f32 %v370_v10, 0.0  ;;  %v475_v16 = vmax.f32 %v470_v12, 0.0 }
  0xf6   : > { %v372_v15 = vpop.f32.mrf.mxu0  ;;  %v472_v17 = vpop.f32.mrf.mxu1 }
  0xf7   : > { %v476_v18 = vmax.f32 %v375_v14, %v475_v16 }
  0xf8   : > { %v1441_v0 = vpop.f32.mrf.mxu0  ;;  %v1459_v19 = vpop.f32.mrf.mxu1 }
 0x10e   : > { %v570_v20 = vpop.f32.mrf.mxu0  ;;  %v671_v21 = vpop.f32.mrf.mxu1 }
 0x10f   : > { %v571_v36 = vadd.f32 %v570_v20, %v284_v7  ;;  %v672_v38 = vadd.f32 %v671_v21, %v284_v7 }
 0x110   : > { %v1476_v22 = vpop.f32.mrf.mxu0  ;;  %v1494_v24 = vpop.f32.mrf.mxu1 }
 0x111   : > { %v576_v37 = vmax.f32 %v571_v36, 0.0  ;;  %v677_v41 = vmax.f32 %v672_v38, 0.0 }
 0x112   : > { %v573_v25 = vpop.f32.mrf.mxu0  ;;  %v674_v23 = vpop.f32.mrf.mxu1 }
 0x113   : > { %v577_v40 = vmax.f32 %v476_v18, %v576_v37 }
 0x114   : > { %v1477_v26 = vpop.f32.mrf.mxu0  ;;  %v1495_v27 = vpop.f32.mrf.mxu1 }
 0x115   : > { %v678_v44 = vmax.f32 %v577_v40, %v677_v41 }
 0x12a   : > { %v772_v28 = vpop.f32.mrf.mxu0  ;;  %v873_v29 = vpop.f32.mrf.mxu1 }
 0x12b   : > { %v773_v39 = vadd.f32 %v772_v28, %v284_v7  ;;  %v874_v43 = vadd.f32 %v873_v29, %v284_v7 }
 0x12c   : > { %v1512_v30 = vpop.f32.mrf.mxu0  ;;  %v1530_v31 = vpop.f32.mrf.mxu1 }
 0x12d   : > { %v778_v42 = vmax.f32 %v773_v39, 0.0  ;;  %v879_v46 = vmax.f32 %v874_v43, 0.0 }
 0x12e   : > { %v775_v32 = vpop.f32.mrf.mxu0  ;;  %v876_v33 = vpop.f32.mrf.mxu1 }
 0x12f   : > { %v779_v45 = vmax.f32 %v678_v44, %v778_v42 }
 0x130   : > { %v1513_v34 = vpop.f32.mrf.mxu0  ;;  %v1531_v35 = vpop.f32.mrf.mxu1 }
 0x131   : > { %v880_v52 = vmax.f32 %v779_v45, %v879_v46 }
 0x146   : > { %v974_v47 = vpop.f32.mrf.mxu0  ;;  %v1075_v49 = vpop.f32.mrf.mxu1 }
 0x147   : > { %v975_v48 = vadd.f32 %v974_v47, %v284_v7  ;;  %v1076_v50 = vadd.f32 %v1075_v49, %v284_v7 }
 0x148   : > { %v1548_v51 = vpop.f32.mrf.mxu0  ;;  %v1566_v54 = vpop.f32.mrf.mxu1 }
 0x149   : > { %v980_v53 = vmax.f32 %v975_v48, 0.0  ;;  %v1081_v57 = vmax.f32 %v1076_v50, 0.0 }
 0x14a   : > { %v977_v55 = vpop.f32.mrf.mxu0  ;;  %v1078_v58 = vpop.f32.mrf.mxu1 }
 0x14b   : > { %v981_v56 = vmax.f32 %v880_v52, %v980_v53 }
 0x14c   : > { %v1549_v59 = vpop.f32.mrf.mxu0  ;;  %v1567_v61 = vpop.f32.mrf.mxu1 }
 0x14d   : > { %v1082_v60 = vmax.f32 %v981_v56, %v1081_v57 }
 0x14f   : > { %v1089_v1 = vmul.f32 %v1087_v62, %v1082_v60 }
 0x151   : > { %v1096_v2 = vadd.f32 %v1094_v63, %v1089_v1 }
 0x153   : > { %1098 = vst.msk [vmem:[%s263_s27] sm:$0xff] %vm1097_vm3, %v1096_v2 }
 0x154 PF: > { %s15_s22 = sadd.s32 1, %s1710_s22   ;;  %s1985_s18 = smov %s1702_s20 }
 0x155   : > { %p12_p8 = scmp.ge.s32.totalorder %s15_s22, 14   ;;  %s1986_s19 = smov %s1706_s21 }
 0x156   : > { %s1987_s20 = smov %s1990_s23  ;;  %s1988_s21 = smov %s1994_s24 }
 0x157   :  { %14 = sbr.rel (!%p12_p8) target bundleno = 3 (0x3), region = 77 }

// kernel: cnn3d3_forward.6
= control target key start
LH: loop header
LB: loop body
LE: loop exit
PB: predicated region body
PF: predicated region fallthrough
CT: control target
= control target key end

     0   :  { %s2229_s18 = smov 0   ;;  %s2231_s19 = smov 0   ;;  %s2598_s0 = inlined_call_operand.vmem [shape: bf16[2,4,4,216,4], index: 0, kind: input, shape index: {}]   ;;  %s2599_s1 = inlined_call_operand.vmem [shape: bf16[16,216], index: 1, kind: input, shape index: {}]   ;;  %s2600_s2 = inlined_call_operand.vmem [shape: f32[16,1], index: 2, kind: input, shape index: {}]   ;;  %s2601_s3 = inlined_call_operand.vmem [shape: f32[16,1], index: 3, kind: input, shape index: {}]   ;;  %s2602_s4 = inlined_call_operand.vmem [shape: f32[16,1], index: 4, kind: input, shape index: {}]   ;;  %s2603_s5 = inlined_call_operand.vmem [shape: f32[2,2,16,4], index: 5, kind: output, shape index: {}]  }
   0x1   :  { %s2233_s20 = smov 0   ;;  %s2235_s21 = smov 0  }
   0x2   :  { %s2237_s22 = smov 0  }
   0x3 LB: > { %s24_s23 = sadd.s32 1, %s2188_s20  ;;  %s27_s24 = sadd.s32 1, %s2192_s21  ;;  %s2196_s22 = sphi %s2237_s22, %s15_s22   ;;  %s2192_s21 = sphi %s2235_s21, %s2607_s21   ;;  %s2188_s20 = sphi %s2233_s20, %s2606_s20   ;;  %s2184_s19 = sphi %s2231_s19, %s2605_s19   ;;  %s2180_s18 = sphi %s2229_s18, %s2604_s18  }
   0x4   : > { %p25_p0 = scmp.ge.s32.totalorder %s24_s23, 2  ;;  %p1678_p1 = scmp.ge.s32.totalorder %s2196_s22, 1 }
   0x5   : > { %p209_p2 = scmp.lt.s32.totalorder %s2196_s22, 5 }
   0x6   : > { %s2609_s23 = smov (%p25_p0, %s24_s23), 0  ;;  %s2611_s24 = smov (!%p25_p0, %s27_s24), %s2192_s21 }
   0x7   : > { %p210_p3 = pnand %p1678_p1, %p209_p2  ;;  %p29_p4 = scmp.ge.s32.totalorder %s2611_s24, 2 }
   0x8   : > { %s1679_s25 = sshll.u32 (!%p210_p3), %s2180_s18, 1  ;;  %p247_p5 = scmp.lt.s32.totalorder (!%p210_p3), %s2184_s19, 1 }
   0x9   : > { %s2613_s24 = smov (%p29_p4, %s2611_s24), 0  ;;  %213 = sbr.rel (%p210_p3) target bundleno = 455 (0x1c7), region = 40 }
   0xa   : > { %p249_p6 = scmp.lt.s32.totalorder (!%p210_p3), %s1679_s25, 3  ;;  %p259_p7 = scmp.lt.s32.totalorder (!%p210_p3), %s2180_s18, 1 }
   0xe   : > { %v2198_v0 = vmov 0   ;;  %v2267_v1 = vld [vmem:[%s2599_s1 + $0x4] ss:$8 sps:$4 sm:$0xff]   ;;  %vm398_vm0 = vcmask 719872   ;;  %s2615_s19 = smov (!%p247_p5, %s2184_s19), 1  ;;  %s2617_s25 = smov (!%p249_p6, %s1679_s25), 3 }
   0xf   : > { %406 = vmatprep.subr.bf16.mxu0 %v2198_v0  ;;  %561 = vmatprep.subr.bf16.mxu1 %v2198_v0  ;;  %s1998_s28 = smul.u32 432, %s2615_s19  ;;  %v269_v2 = vld [vmem:[%s2600_s2] sm:$0xff]  ;;  %vm402_vm1 = vcmask 1043456   ;;  %v270_v39 = vld [vmem:[%s2600_s2 + $0x8] sm:$0xff]  ;;  %s2619_s18 = smov (!%p259_p7, %s2180_s18), 1  ;;  %vm1576_vm2 = vcmask 31744  }
  0x10   : > { %2040 = vset.pattern.permute.xlu0 %v2198_v0  ;;  %2041 = vset.pattern.permute.xlu1 %v2198_v0  ;;  %s1997_s29 = smul.u32 108, %s2617_s25  ;;  %v2345_v33 = vld [vmem:[%s2599_s1] ss:$8 sps:$4 sm:$0xff]   ;;  %s1682_s9 = sshll.u32 %s2615_s19, 2 }
  0x11   : > { %1700 = vmatprep.mubr.msk.bf16.mxu0 %vm398_vm0, %v2267_v1  ;;  %1742 = vmatprep.mubr.msk.bf16.mxu1 %vm398_vm0, %v2267_v1 }
  0x12   : > { %s253_s7 = sadd.s32 %s1998_s28, %s1997_s29  ;;  %300 = vperm.xlu0 %2040, %v269_v2  }
  0x13   : > { %s1680_s8 = sshll.u32 %s253_s7, 2 }
  0x14   : > { %s2284_s11 = scalar_lea.vmem %s2598_s0, %s1680_s8  ;;  %s1681_s8 = sshll.u32 %s2619_s18, 1 }
  0x15   : > { %v2042_v3 = vld [vmem:[%s2284_s11 + $0x38] sm:$0xff]   ;;  %v2043_v4 = vld [vmem:[%s2284_s11 + $0xa4] sm:$0xff]   ;;  %v2044_v5 = vld [vmem:[%s2284_s11 + $0x30] sm:$0xff]   ;;  %s263_s10 = sadd.s32 %s1682_s9, %s1681_s8 }
  0x16   : > { %407 = vmatpush1.bf16.msra.mxu0 %v2042_v3  ;;  %562 = vmatpush1.bf16.msra.mxu1 %v2043_v4  ;;  %v2045_v6 = vld [vmem:[%s2284_s11 + $0x9c] sm:$0xff]   ;;  %v2046_v7 = vld [vmem:[%s2284_s11 + $0x28] sm:$0xff]   ;;  %v2047_v8 = vld [vmem:[%s2284_s11 + $0x94] sm:$0xff]   ;;  %s1683_s18 = sshll.u32 %s263_s10, 3 }
  0x17   : > { %408 = vmatprep.subr.bf16.mxu0 %v2198_v0  ;;  %563 = vmatprep.subr.bf16.mxu1 %v2198_v0  ;;  %v2048_v9 = vld [vmem:[%s2284_s11 + $0x20] sm:$0xff]   ;;  %v2049_v10 = vld [vmem:[%s2284_s11 + $0x8c] sm:$0xff]   ;;  %v2050_v11 = vld [vmem:[%s2284_s11 + $0x18] sm:$0xff]   ;;  %s265_s12 = scalar_lea.vmem %s2603_s5, %s1683_s18 }
  0x18   : > { %v2051_v12 = vld [vmem:[%s2284_s11 + $0x84] sm:$0xff]   ;;  %v2052_v13 = vld [vmem:[%s2284_s11 + $0x10] sm:$0xff]   ;;  %v2053_v14 = vld [vmem:[%s2284_s11 + $0x7c] sm:$0xff]   ;;  %305 = vperm.xlu0 %2040, %v270_v39  }
  0x19   : > { %v2054_v15 = vld [vmem:[%s2284_s11 + $0x8] sm:$0xff]   ;;  %v2055_v16 = vld [vmem:[%s2284_s11 + $0x74] sm:$0xff]   ;;  %v2056_v17 = vld [vmem:[%s2284_s11] sm:$0xff]  }
  0x1a   : > { %409 = vmatpush1.bf16.msra.mxu0 %v2044_v5  ;;  %564 = vmatpush1.bf16.msra.mxu1 %v2045_v6  ;;  %v2057_v18 = vld [vmem:[%s2284_s11 + $0x6c] sm:$0xff]   ;;  %v2058_v19 = vld [vmem:[%s2284_s11 + $0x68] ss:$0 sps:$4 sm:$0xff]   ;;  %v2059_v20 = vld [vmem:[%s2284_s11 + $0xd4] ss:$0 sps:$4 sm:$0xff]  }
  0x1b   : > { %410 = vmatprep.subr.bf16.mxu0 %v2198_v0  ;;  %565 = vmatprep.subr.bf16.mxu1 %v2198_v0  ;;  %v404_v21 = vsel %vm402_vm1, %v2058_v19, 0  ;;  %v559_v22 = vsel %vm402_vm1, %v2059_v20, 0  ;;  %v2060_v23 = vld [vmem:[%s2284_s11 + $0x60] sm:$0xff]   ;;  %v2061_v24 = vld [vmem:[%s2284_s11 + $0xcc] sm:$0xff]   ;;  %v2062_v25 = vld [vmem:[%s2284_s11 + $0x58] sm:$0xff]  }
  0x1c   : > { %v2063_v26 = vld [vmem:[%s2284_s11 + $0xc4] sm:$0xff]   ;;  %v2064_v27 = vld [vmem:[%s2284_s11 + $0x50] sm:$0xff]   ;;  %v2065_v28 = vld [vmem:[%s2284_s11 + $0xbc] sm:$0xff]  }
  0x1d   : > { %v2066_v29 = vld [vmem:[%s2284_s11 + $0x48] sm:$0xff]   ;;  %v2067_v30 = vld [vmem:[%s2284_s11 + $0xb4] sm:$0xff]   ;;  %v2068_v31 = vld [vmem:[%s2284_s11 + $0x40] sm:$0xff]  }
  0x1e   : > { %411 = vmatpush1.bf16.msra.mxu0 %v2046_v7  ;;  %566 = vmatpush1.bf16.msra.mxu1 %v2047_v8  ;;  %v2069_v32 = vld [vmem:[%s2284_s11 + $0xac] sm:$0xff]   ;;  %v2074_v35 = vld [vmem:[%s2284_s11 + $0x17c] sm:$0xff]   ;;  %v2076_v37 = vld [vmem:[%s2284_s11 + $0x174] sm:$0xff]  }
  0x1f   : > { %412 = vmatprep.subr.bf16.mxu0 %v2198_v0  ;;  %567 = vmatprep.subr.bf16.mxu1 %v2198_v0  ;;  %v2073_v34 = vld [vmem:[%s2284_s11 + $0x110] sm:$0xff]   ;;  %v2075_v36 = vld [vmem:[%s2284_s11 + $0x108] sm:$0xff]   ;;  %v2077_v38 = vld [vmem:[%s2284_s11 + $0x100] sm:$0xff]  }
  0x20   : > { %v2078_v40 = vld [vmem:[%s2284_s11 + $0x16c] sm:$0xff]   ;;  %v2079_v41 = vld [vmem:[%s2284_s11 + $0xf8] sm:$0xff]   ;;  %v2080_v42 = vld [vmem:[%s2284_s11 + $0x164] sm:$0xff]  }
  0x21   : > { %v2081_v43 = vld [vmem:[%s2284_s11 + $0xf0] sm:$0xff]   ;;  %v2082_v44 = vld [vmem:[%s2284_s11 + $0x15c] sm:$0xff]   ;;  %v2083_v45 = vld [vmem:[%s2284_s11 + $0xe8] sm:$0xff]  }
  0x22   : > { %413 = vmatpush1.bf16.msra.mxu0 %v2048_v9  ;;  %568 = vmatpush1.bf16.msra.mxu1 %v2049_v10  ;;  %v2084_v46 = vld [vmem:[%s2284_s11 + $0x154] sm:$0xff]   ;;  %v2085_v47 = vld [vmem:[%s2284_s11 + $0xe0] sm:$0xff]   ;;  %v2086_v48 = vld [vmem:[%s2284_s11 + $0x14c] sm:$0xff]  }
  0x23   : > { %414 = vmatprep.subr.bf16.mxu0 %v2198_v0  ;;  %569 = vmatprep.subr.bf16.mxu1 %v2198_v0  ;;  %v2087_v49 = vld [vmem:[%s2284_s11 + $0xd8] sm:$0xff]   ;;  %v2088_v50 = vld [vmem:[%s2284_s11 + $0x144] sm:$0xff]   ;;  %v2089_v51 = vld [vmem:[%s2284_s11 + $0x140] ss:$0 sps:$4 sm:$0xff]  }
  0x24   : > { %v2090_v52 = vld [vmem:[%s2284_s11 + $0x1ac] ss:$0 sps:$4 sm:$0xff]   ;;  %v716_v53 = vsel %vm402_vm1, %v2089_v51, 0  ;;  %v2091_v55 = vld [vmem:[%s2284_s11 + $0x138] sm:$0xff]   ;;  %v2092_v56 = vld [vmem:[%s2284_s11 + $0x1a4] sm:$0xff]  }
  0x25   : > { %v873_v54 = vsel %vm402_vm1, %v2090_v52, 0  ;;  %v2093_v57 = vld [vmem:[%s2284_s11 + $0x130] sm:$0xff]   ;;  %v2094_v58 = vld [vmem:[%s2284_s11 + $0x19c] sm:$0xff]   ;;  %v2095_v59 = vld [vmem:[%s2284_s11 + $0x128] sm:$0xff]  }
  0x26   : > { %415 = vmatpush1.bf16.msra.mxu0 %v2050_v11  ;;  %570 = vmatpush1.bf16.msra.mxu1 %v2051_v12  ;;  %v2096_v60 = vld [vmem:[%s2284_s11 + $0x194] sm:$0xff]   ;;  %v2097_v61 = vld [vmem:[%s2284_s11 + $0x120] sm:$0xff]   ;;  %v2098_v62 = vld [vmem:[%s2284_s11 + $0x18c] sm:$0xff]  }
  0x27   : > { %416 = vmatprep.subr.bf16.mxu0 %v2198_v0  ;;  %571 = vmatprep.subr.bf16.mxu1 %v2198_v0  ;;  %v2099_v63 = vld [vmem:[%s2284_s11 + $0x118] sm:$0xff]   ;;  %v2100_v2 = vld [vmem:[%s2284_s11 + $0x184] sm:$0xff]   ;;  %v2104_v6 = vld [vmem:[%s2284_s11 + $0x24c] sm:$0xff]  }
  0x28   : > { %v2101_v3 = vld [vmem:[%s2284_s11 + $0x1e8] sm:$0xff]   ;;  %v2102_v4 = vld [vmem:[%s2284_s11 + $0x254] sm:$0xff]   ;;  %v2103_v5 = vld [vmem:[%s2284_s11 + $0x1e0] sm:$0xff]  }
  0x29   : > { %v2105_v7 = vld [vmem:[%s2284_s11 + $0x1d8] sm:$0xff]   ;;  %v2106_v8 = vld [vmem:[%s2284_s11 + $0x244] sm:$0xff]   ;;  %v2107_v9 = vld [vmem:[%s2284_s11 + $0x1d0] sm:$0xff]  }
  0x2a   : > { %417 = vmatpush1.bf16.msra.mxu0 %v2052_v13  ;;  %572 = vmatpush1.bf16.msra.mxu1 %v2053_v14  ;;  %v2108_v10 = vld [vmem:[%s2284_s11 + $0x23c] sm:$0xff]   ;;  %v2110_v11 = vld [vmem:[%s2284_s11 + $0x234] sm:$0xff]   ;;  %v2112_v13 = vld [vmem:[%s2284_s11 + $0x22c] sm:$0xff]  }
  0x2b   : > { %418 = vmatprep.subr.bf16.mxu0 %v2198_v0  ;;  %573 = vmatprep.subr.bf16.mxu1 %v2198_v0  ;;  %v2111_v12 = vld [vmem:[%s2284_s11 + $0x1c0] sm:$0xff]   ;;  %v2115_v19 = vld [vmem:[%s2284_s11 + $0x1b0] sm:$0xff]   ;;  %v1563_v20 = vld [vmem:[%s2602_s4 + $0x8] sm:$0xff] }
  0x2c   : > { %v1562_v14 = vld [vmem:[%s2602_s4] sm:$0xff]  ;;  %v2131_v39 = vld [vmem:[%s2284_s11 + $0x2b8] sm:$0xff]   ;;  %v2143_v52 = vld [vmem:[%s2284_s11 + $0x288] sm:$0xff]  }
  0x2d   : > { %1566 = vperm.xlu0 %2040, %v1562_v14   ;;  %v2142_v51 = vld [vmem:[%s2284_s11 + $0x2fc] sm:$0xff]  }
  0x2e   : > { %419 = vmatpush1.bf16.msra.mxu0 %v2054_v15  ;;  %574 = vmatpush1.bf16.msra.mxu1 %v2055_v16  ;;  %v1548_v15 = vld [vmem:[%s2601_s3] sm:$0xff]  ;;  %v2113_v16 = vld [vmem:[%s2284_s11 + $0x1b8] sm:$0xff]  }
  0x2f   : > { %420 = vmatprep.subr.bf16.mxu0 %v2198_v0  ;;  %575 = vmatprep.subr.bf16.mxu1 %v2198_v0 }
  0x30   : > { %1552 = vperm.xlu1 %2041, %v1548_v15  }
  0x32   : > { %421 = vmatpush1.bf16.msra.mxu0 %v2056_v17  ;;  %576 = vmatpush1.bf16.msra.mxu1 %v2057_v18  ;;  %v1549_v17 = vld [vmem:[%s2601_s3 + $0x8] sm:$0xff] }
  0x33   : > { %426 = vmatprep.subr.bf16.mxu0 %v2198_v0  ;;  %581 = vmatprep.subr.bf16.mxu1 %v2198_v0  ;;  %v2114_v18 = vld [vmem:[%s2284_s11 + $0x224] sm:$0xff]  }
  0x34   : > { %1557 = vperm.xlu1 %2041, %v1549_v17  }
  0x36   : > { %427 = vmatpush2.bf16.msra.mxu0 %v404_v21  ;;  %582 = vmatpush2.bf16.msra.mxu1 %v559_v22  ;;  %v2116_v21 = vld [vmem:[%s2284_s11 + $0x21c] sm:$0xff]   ;;  %v2117_v22 = vld [vmem:[%s2284_s11 + $0x218] ss:$0 sps:$4 sm:$0xff]  }
  0x37   : > { %428 = vmatprep.subr.bf16.mxu0 %v2198_v0  ;;  %583 = vmatprep.subr.bf16.mxu1 %v2198_v0 }
  0x38   : > { %1571 = vperm.xlu1 %2041, %v1563_v20  }
  0x3a   : > { %429 = vmatpush2.bf16.msra.mxu0 %v2060_v23  ;;  %584 = vmatpush2.bf16.msra.mxu1 %v2061_v24  ;;  %v2118_v23 = vld [vmem:[%s2284_s11 + $0x284] ss:$0 sps:$4 sm:$0xff]   ;;  %v1030_v24 = vsel %vm402_vm1, %v2117_v22, 0 }
  0x3b   : > { %430 = vmatprep.subr.bf16.mxu0 %v2198_v0  ;;  %585 = vmatprep.subr.bf16.mxu1 %v2198_v0 }
  0x3e   : > { %431 = vmatpush2.bf16.msra.mxu0 %v2062_v25  ;;  %586 = vmatpush2.bf16.msra.mxu1 %v2063_v26  ;;  %v1187_v25 = vsel %vm402_vm1, %v2118_v23, 0  ;;  %v2119_v26 = vld [vmem:[%s2284_s11 + $0x210] sm:$0xff]  }
  0x3f   : > { %432 = vmatprep.subr.bf16.mxu0 %v2198_v0  ;;  %587 = vmatprep.subr.bf16.mxu1 %v2198_v0 }
  0x42   : > { %433 = vmatpush2.bf16.msra.mxu0 %v2064_v27  ;;  %588 = vmatpush2.bf16.msra.mxu1 %v2065_v28  ;;  %v2120_v27 = vld [vmem:[%s2284_s11 + $0x27c] sm:$0xff]   ;;  %v2121_v28 = vld [vmem:[%s2284_s11 + $0x208] sm:$0xff]  }
  0x43   : > { %434 = vmatprep.subr.bf16.mxu0 %v2198_v0  ;;  %589 = vmatprep.subr.bf16.mxu1 %v2198_v0 }
  0x46   : > { %435 = vmatpush2.bf16.msra.mxu0 %v2066_v29  ;;  %590 = vmatpush2.bf16.msra.mxu1 %v2067_v30  ;;  %v2122_v29 = vld [vmem:[%s2284_s11 + $0x274] sm:$0xff]   ;;  %v2123_v30 = vld [vmem:[%s2284_s11 + $0x200] sm:$0xff]  }
  0x47   : > { %436 = vmatprep.subr.bf16.mxu0 %v2198_v0  ;;  %591 = vmatprep.subr.bf16.mxu1 %v2198_v0 }
  0x4a   : > { %437 = vmatpush2.bf16.msra.mxu0 %v2068_v31  ;;  %592 = vmatpush2.bf16.msra.mxu1 %v2069_v32  ;;  %v2124_v31 = vld [vmem:[%s2284_s11 + $0x26c] sm:$0xff]   ;;  %v2125_v32 = vld [vmem:[%s2284_s11 + $0x1f8] sm:$0xff]  }
  0x4b   : > { %718 = vmatprep.subr.bf16.mxu0 %v2198_v0  ;;  %875 = vmatprep.subr.bf16.mxu1 %v2198_v0 }
  0x4d   : > { %439 = vmatmul.mubr.bf16.vlgmr.msra.gmra.mxu0 %v2345_v33  ;;  %594 = vmatmul.mubr.bf16.vlgmr.msra.gmra.mxu1 %v2345_v33 }
  0x4e   : > { %719 = vmatpush1.bf16.msra.mxu0 %v2073_v34  ;;  %876 = vmatpush1.bf16.msra.mxu1 %v2074_v35  ;;  %v2126_v34 = vld [vmem:[%s2284_s11 + $0x264] sm:$0xff]   ;;  %v2127_v35 = vld [vmem:[%s2284_s11 + $0x1f0] sm:$0xff]  }
  0x4f   : > { %720 = vmatprep.subr.bf16.mxu0 %v2198_v0  ;;  %877 = vmatprep.subr.bf16.mxu1 %v2198_v0 }
  0x50   : > { %1784 = vmatprep.mubr.msk.bf16.mxu0 %vm398_vm0, %v2267_v1  ;;  %1826 = vmatprep.mubr.msk.bf16.mxu1 %vm398_vm0, %v2267_v1 }
  0x52   : > { %721 = vmatpush1.bf16.msra.mxu0 %v2075_v36  ;;  %878 = vmatpush1.bf16.msra.mxu1 %v2076_v37  ;;  %v2128_v36 = vld [vmem:[%s2284_s11 + $0x25c] sm:$0xff]  }
  0x53   : > { %722 = vmatprep.subr.bf16.mxu0 %v2198_v0  ;;  %879 = vmatprep.subr.bf16.mxu1 %v2198_v0  ;;  %v2129_v37 = vld [vmem:[%s2284_s11 + $0x2c0] sm:$0xff]  }
  0x56   : > { %723 = vmatpush1.bf16.msra.mxu0 %v2077_v38  ;;  %880 = vmatpush1.bf16.msra.mxu1 %v2078_v40  ;;  %v2130_v38 = vld [vmem:[%s2284_s11 + $0x32c] sm:$0xff]   ;;  %v2132_v40 = vld [vmem:[%s2284_s11 + $0x324] sm:$0xff]  }
  0x57   : > { %724 = vmatprep.subr.bf16.mxu0 %v2198_v0  ;;  %881 = vmatprep.subr.bf16.mxu1 %v2198_v0 }
  0x5a   : > { %725 = vmatpush1.bf16.msra.mxu0 %v2079_v41  ;;  %882 = vmatpush1.bf16.msra.mxu1 %v2080_v42  ;;  %v2157_v41 = vld [vmem:[%s2599_s1 + $0x4] ss:$8 sps:$4 sm:$0xff]   ;;  %v2133_v42 = vld [vmem:[%s2284_s11 + $0x2b0] sm:$0xff]  }
  0x5b   : > { %726 = vmatprep.subr.bf16.mxu0 %v2198_v0  ;;  %883 = vmatprep.subr.bf16.mxu1 %v2198_v0 }
  0x5e   : > { %727 = vmatpush1.bf16.msra.mxu0 %v2081_v43  ;;  %884 = vmatpush1.bf16.msra.mxu1 %v2082_v44  ;;  %v2134_v43 = vld [vmem:[%s2284_s11 + $0x31c] sm:$0xff]   ;;  %v2135_v44 = vld [vmem:[%s2284_s11 + $0x2a8] sm:$0xff]  }
  0x5f   : > { %728 = vmatprep.subr.bf16.mxu0 %v2198_v0  ;;  %885 = vmatprep.subr.bf16.mxu1 %v2198_v0 }
  0x62   : > { %729 = vmatpush1.bf16.msra.mxu0 %v2083_v45  ;;  %886 = vmatpush1.bf16.msra.mxu1 %v2084_v46  ;;  %v2136_v45 = vld [vmem:[%s2284_s11 + $0x314] sm:$0xff]   ;;  %v2137_v46 = vld [vmem:[%s2284_s11 + $0x2a0] sm:$0xff]  }
  0x63   : > { %730 = vmatprep.subr.bf16.mxu0 %v2198_v0  ;;  %887 = vmatprep.subr.bf16.mxu1 %v2198_v0 }
  0x66   : > { %731 = vmatpush1.bf16.msra.mxu0 %v2085_v47  ;;  %888 = vmatpush1.bf16.msra.mxu1 %v2086_v48  ;;  %v2138_v47 = vld [vmem:[%s2284_s11 + $0x30c] sm:$0xff]   ;;  %v2139_v48 = vld [vmem:[%s2284_s11 + $0x298] sm:$0xff]  }
  0x67   : > { %732 = vmatprep.subr.bf16.mxu0 %v2198_v0  ;;  %889 = vmatprep.subr.bf16.mxu1 %v2198_v0 }
  0x6a   : > { %733 = vmatpush1.bf16.msra.mxu0 %v2087_v49  ;;  %890 = vmatpush1.bf16.msra.mxu1 %v2088_v50  ;;  %v2140_v49 = vld [vmem:[%s2284_s11 + $0x304] sm:$0xff]   ;;  %v2141_v50 = vld [vmem:[%s2284_s11 + $0x290] sm:$0xff]  }
  0x6b   : > { %738 = vmatprep.subr.bf16.mxu0 %v2198_v0  ;;  %895 = vmatprep.subr.bf16.mxu1 %v2198_v0 }
  0x6e   : > { %739 = vmatpush2.bf16.msra.mxu0 %v716_v53  ;;  %896 = vmatpush2.bf16.msra.mxu1 %v873_v54  ;;  %v2144_v53 = vld [vmem:[%s2284_s11 + $0x2f4] sm:$0xff]   ;;  %v2145_v54 = vld [vmem:[%s2284_s11 + $0x2f0] ss:$0 sps:$4 sm:$0xff]  }
  0x6f   : > { %740 = vmatprep.subr.bf16.mxu0 %v2198_v0  ;;  %897 = vmatprep.subr.bf16.mxu1 %v2198_v0 }
  0x72   : > { %741 = vmatpush2.bf16.msra.mxu0 %v2091_v55  ;;  %898 = vmatpush2.bf16.msra.mxu1 %v2092_v56  ;;  %v2146_v55 = vld [vmem:[%s2284_s11 + $0x35c] ss:$0 sps:$4 sm:$0xff]   ;;  %v1344_v56 = vsel %vm402_vm1, %v2145_v54, 0 }
  0x73   : > { %742 = vmatprep.subr.bf16.mxu0 %v2198_v0  ;;  %899 = vmatprep.subr.bf16.mxu1 %v2198_v0 }
  0x76   : > { %743 = vmatpush2.bf16.msra.mxu0 %v2093_v57  ;;  %900 = vmatpush2.bf16.msra.mxu1 %v2094_v58  ;;  %v1501_v57 = vsel %vm402_vm1, %v2146_v55, 0  ;;  %v2147_v58 = vld [vmem:[%s2284_s11 + $0x2e8] sm:$0xff]  }
  0x77   : > { %744 = vmatprep.subr.bf16.mxu0 %v2198_v0  ;;  %901 = vmatprep.subr.bf16.mxu1 %v2198_v0 }
  0x7a   : > { %745 = vmatpush2.bf16.msra.mxu0 %v2095_v59  ;;  %902 = vmatpush2.bf16.msra.mxu1 %v2096_v60  ;;  %v2148_v59 = vld [vmem:[%s2284_s11 + $0x354] sm:$0xff]   ;;  %v2149_v60 = vld [vmem:[%s2284_s11 + $0x2e0] sm:$0xff]  }
  0x7b   : > { %746 = vmatprep.subr.bf16.mxu0 %v2198_v0  ;;  %903 = vmatprep.subr.bf16.mxu1 %v2198_v0 }
  0x7e   : > { %747 = vmatpush2.bf16.msra.mxu0 %v2097_v61  ;;  %904 = vmatpush2.bf16.msra.mxu1 %v2098_v62  ;;  %v2150_v61 = vld [vmem:[%s2284_s11 + $0x34c] sm:$0xff]   ;;  %v2151_v62 = vld [vmem:[%s2284_s11 + $0x2d8] sm:$0xff]  }
  0x7f   : > { %748 = vmatprep.subr.bf16.mxu0 %v2198_v0  ;;  %905 = vmatprep.subr.bf16.mxu1 %v2198_v0 }
  0x82   : > { %749 = vmatpush2.bf16.msra.mxu0 %v2099_v63  ;;  %906 = vmatpush2.bf16.msra.mxu1 %v2100_v2  ;;  %v2152_v63 = vld [vmem:[%s2284_s11 + $0x344] sm:$0xff]   ;;  %v2153_v2 = vld [vmem:[%s2284_s11 + $0x2d0] sm:$0xff]  }
  0x83   : > { %1032 = vmatprep.subr.bf16.mxu0 %v2198_v0  ;;  %1189 = vmatprep.subr.bf16.mxu1 %v2198_v0 }
  0x85   : > { %751 = vmatmul.mubr.bf16.vlgmr.msra.gmra.mxu0 %v2345_v33  ;;  %908 = vmatmul.mubr.bf16.vlgmr.msra.gmra.mxu1 %v2345_v33 }
  0x86   : > { %1033 = vmatpush1.bf16.msra.mxu0 %v2101_v3  ;;  %1190 = vmatpush1.bf16.msra.mxu1 %v2102_v4  ;;  %v2154_v3 = vld [vmem:[%s2284_s11 + $0x33c] sm:$0xff]   ;;  %v2155_v4 = vld [vmem:[%s2284_s11 + $0x2c8] sm:$0xff]  }
  0x87   : > { %1034 = vmatprep.subr.bf16.mxu0 %v2198_v0  ;;  %1191 = vmatprep.subr.bf16.mxu1 %v2198_v0 }
  0x88   : > { %1868 = vmatprep.mubr.msk.bf16.mxu0 %vm398_vm0, %v2267_v1  ;;  %1910 = vmatprep.mubr.msk.bf16.mxu1 %vm398_vm0, %v2267_v1  ;;  %v2109_v1 = vld [vmem:[%s2284_s11 + $0x1c8] sm:$0xff]  }
  0x8a   : > { %1035 = vmatpush1.bf16.msra.mxu0 %v2103_v5  ;;  %1192 = vmatpush1.bf16.msra.mxu1 %v2104_v6  ;;  %v2156_v5 = vld [vmem:[%s2284_s11 + $0x334] sm:$0xff]  }
  0x8b   : > { %1036 = vmatprep.subr.bf16.mxu0 %v2198_v0  ;;  %1193 = vmatprep.subr.bf16.mxu1 %v2198_v0 }
  0x8d   : > { %v2557_v6 = vpop.permute.xlu0 %300 }
  0x8e   : > { %1037 = vmatpush1.bf16.msra.mxu0 %v2105_v7  ;;  %1194 = vmatpush1.bf16.msra.mxu1 %v2106_v8 }
  0x8f   : > { %1038 = vmatprep.subr.bf16.mxu0 %v2198_v0  ;;  %1195 = vmatprep.subr.bf16.mxu1 %v2198_v0 }
  0x92   : > { %1039 = vmatpush1.bf16.msra.mxu0 %v2107_v9  ;;  %1196 = vmatpush1.bf16.msra.mxu1 %v2108_v10 }
  0x93   : > { %1040 = vmatprep.subr.bf16.mxu0 %v2198_v0  ;;  %1197 = vmatprep.subr.bf16.mxu1 %v2198_v0 }
  0x96   : > { %1041 = vmatpush1.bf16.msra.mxu0 %v2109_v1  ;;  %1198 = vmatpush1.bf16.msra.mxu1 %v2110_v11  ;;  %v2561_v11 = vpop.permute.xlu0 %305 }
  0x97   : > { %1042 = vmatprep.subr.bf16.mxu0 %v2198_v0  ;;  %1199 = vmatprep.subr.bf16.mxu1 %v2198_v0 }
  0x9a   : > { %1043 = vmatpush1.bf16.msra.mxu0 %v2111_v12  ;;  %1200 = vmatpush1.bf16.msra.mxu1 %v2112_v13 }
  0x9b   : > { %1044 = vmatprep.subr.bf16.mxu0 %v2198_v0  ;;  %1201 = vmatprep.subr.bf16.mxu1 %v2198_v0 }
  0x9e   : > { %1045 = vmatpush1.bf16.msra.mxu0 %v2113_v16  ;;  %1202 = vmatpush1.bf16.msra.mxu1 %v2114_v18 }
  0x9f   : > { %1046 = vmatprep.subr.bf16.mxu0 %v2198_v0  ;;  %1203 = vmatprep.subr.bf16.mxu1 %v2198_v0 }
  0xa2   : > { %1047 = vmatpush1.bf16.msra.mxu0 %v2115_v19  ;;  %1204 = vmatpush1.bf16.msra.mxu1 %v2116_v21 }
  0xa3   : > { %1052 = vmatprep.subr.bf16.mxu0 %v2198_v0  ;;  %1209 = vmatprep.subr.bf16.mxu1 %v2198_v0 }
  0xa6   : > { %1053 = vmatpush2.bf16.msra.mxu0 %v1030_v24  ;;  %1210 = vmatpush2.bf16.msra.mxu1 %v1187_v25 }
  0xa7   : > { %1054 = vmatprep.subr.bf16.mxu0 %v2198_v0  ;;  %1211 = vmatprep.subr.bf16.mxu1 %v2198_v0 }
  0xaa   : > { %1055 = vmatpush2.bf16.msra.mxu0 %v2119_v26  ;;  %1212 = vmatpush2.bf16.msra.mxu1 %v2120_v27 }
  0xab   : > { %1056 = vmatprep.subr.bf16.mxu0 %v2198_v0  ;;  %1213 = vmatprep.subr.bf16.mxu1 %v2198_v0 }
  0xae   : > { %1057 = vmatpush2.bf16.msra.mxu0 %v2121_v28  ;;  %1214 = vmatpush2.bf16.msra.mxu1 %v2122_v29 }
  0xaf   : > { %1058 = vmatprep.subr.bf16.mxu0 %v2198_v0  ;;  %1215 = vmatprep.subr.bf16.mxu1 %v2198_v0 }
  0xb2   : > { %1059 = vmatpush2.bf16.msra.mxu0 %v2123_v30  ;;  %1216 = vmatpush2.bf16.msra.mxu1 %v2124_v31 }
  0xb3   : > { %1060 = vmatprep.subr.bf16.mxu0 %v2198_v0  ;;  %1217 = vmatprep.subr.bf16.mxu1 %v2198_v0 }
  0xb6   : > { %1061 = vmatpush2.bf16.msra.mxu0 %v2125_v32  ;;  %1218 = vmatpush2.bf16.msra.mxu1 %v2126_v34 }
  0xb7   : > { %1062 = vmatprep.subr.bf16.mxu0 %v2198_v0  ;;  %1219 = vmatprep.subr.bf16.mxu1 %v2198_v0 }
  0xba   : > { %1063 = vmatpush2.bf16.msra.mxu0 %v2127_v35  ;;  %1220 = vmatpush2.bf16.msra.mxu1 %v2128_v36 }
  0xbb   : > { %1346 = vmatprep.subr.bf16.mxu0 %v2198_v0  ;;  %1503 = vmatprep.subr.bf16.mxu1 %v2198_v0 }
  0xbd   : > { %1065 = vmatmul.mubr.bf16.vlgmr.msra.gmra.mxu0 %v2345_v33  ;;  %1222 = vmatmul.mubr.bf16.vlgmr.msra.gmra.mxu1 %v2345_v33 }
  0xbe   : > { %1347 = vmatpush1.bf16.msra.mxu0 %v2129_v37  ;;  %1504 = vmatpush1.bf16.msra.mxu1 %v2130_v38 }
  0xbf   : > { %1348 = vmatprep.subr.bf16.mxu0 %v2198_v0  ;;  %1505 = vmatprep.subr.bf16.mxu1 %v2198_v0 }
  0xc0   : > { %1952 = vmatprep.mubr.msk.bf16.mxu0 %vm398_vm0, %v2157_v41  ;;  %1994 = vmatprep.mubr.msk.bf16.mxu1 %vm398_vm0, %v2157_v41 }
  0xc2   : > { %1349 = vmatpush1.bf16.msra.mxu0 %v2131_v39  ;;  %1506 = vmatpush1.bf16.msra.mxu1 %v2132_v40 }
  0xc3   : > { %1350 = vmatprep.subr.bf16.mxu0 %v2198_v0  ;;  %1507 = vmatprep.subr.bf16.mxu1 %v2198_v0 }
  0xc6   : > { %1351 = vmatpush1.bf16.msra.mxu0 %v2133_v42  ;;  %1508 = vmatpush1.bf16.msra.mxu1 %v2134_v43 }
  0xc7   : > { %1352 = vmatprep.subr.bf16.mxu0 %v2198_v0  ;;  %1509 = vmatprep.subr.bf16.mxu1 %v2198_v0 }
  0xca   : > { %1353 = vmatpush1.bf16.msra.mxu0 %v2135_v44  ;;  %1510 = vmatpush1.bf16.msra.mxu1 %v2136_v45 }
  0xcb   : > { %1354 = vmatprep.subr.bf16.mxu0 %v2198_v0  ;;  %1511 = vmatprep.subr.bf16.mxu1 %v2198_v0 }
  0xce   : > { %1355 = vmatpush1.bf16.msra.mxu0 %v2137_v46  ;;  %1512 = vmatpush1.bf16.msra.mxu1 %v2138_v47 }
  0xcf   : > { %1356 = vmatprep.subr.bf16.mxu0 %v2198_v0  ;;  %1513 = vmatprep.subr.bf16.mxu1 %v2198_v0 }
  0xd2   : > { %1357 = vmatpush1.bf16.msra.mxu0 %v2139_v48  ;;  %1514 = vmatpush1.bf16.msra.mxu1 %v2140_v49 }
  0xd3   : > { %1358 = vmatprep.subr.bf16.mxu0 %v2198_v0  ;;  %1515 = vmatprep.subr.bf16.mxu1 %v2198_v0 }
  0xd6   : > { %1359 = vmatpush1.bf16.msra.mxu0 %v2141_v50  ;;  %1516 = vmatpush1.bf16.msra.mxu1 %v2142_v51 }
  0xd7   : > { %1360 = vmatprep.subr.bf16.mxu0 %v2198_v0  ;;  %1517 = vmatprep.subr.bf16.mxu1 %v2198_v0 }
  0xda   : > { %1361 = vmatpush1.bf16.msra.mxu0 %v2143_v52  ;;  %1518 = vmatpush1.bf16.msra.mxu1 %v2144_v53 }
  0xdb   : > { %1366 = vmatprep.subr.bf16.mxu0 %v2198_v0  ;;  %1523 = vmatprep.subr.bf16.mxu1 %v2198_v0 }
  0xde   : > { %1367 = vmatpush2.bf16.msra.mxu0 %v1344_v56  ;;  %1524 = vmatpush2.bf16.msra.mxu1 %v1501_v57 }
  0xdf   : > { %1368 = vmatprep.subr.bf16.mxu0 %v2198_v0  ;;  %1525 = vmatprep.subr.bf16.mxu1 %v2198_v0 }
  0xe2   : > { %1369 = vmatpush2.bf16.msra.mxu0 %v2147_v58  ;;  %1526 = vmatpush2.bf16.msra.mxu1 %v2148_v59 }
  0xe3   : > { %1370 = vmatprep.subr.bf16.mxu0 %v2198_v0  ;;  %1527 = vmatprep.subr.bf16.mxu1 %v2198_v0 }
  0xe6   : > { %1371 = vmatpush2.bf16.msra.mxu0 %v2149_v60  ;;  %1528 = vmatpush2.bf16.msra.mxu1 %v2150_v61 }
  0xe7   : > { %1372 = vmatprep.subr.bf16.mxu0 %v2198_v0  ;;  %1529 = vmatprep.subr.bf16.mxu1 %v2198_v0 }
  0xea   : > { %1373 = vmatpush2.bf16.msra.mxu0 %v2151_v62  ;;  %1530 = vmatpush2.bf16.msra.mxu1 %v2152_v63  ;;  %v1553_v63 = vpop.permute.xlu1 %1552 }
  0xeb   : > { %1374 = vmatprep.subr.bf16.mxu0 %v2198_v0  ;;  %1531 = vmatprep.subr.bf16.mxu1 %v2198_v0 }
  0xee   : > { %1375 = vmatpush2.bf16.msra.mxu0 %v2153_v2  ;;  %1532 = vmatpush2.bf16.msra.mxu1 %v2154_v3 }
  0xef   : > { %1376 = vmatprep.subr.bf16.mxu0 %v2198_v0  ;;  %1533 = vmatprep.subr.bf16.mxu1 %v2198_v0 }
  0xf2   : > { %1377 = vmatpush2.bf16.msra.mxu0 %v2155_v4  ;;  %1534 = vmatpush2.bf16.msra.mxu1 %v2156_v5 }
  0xf5   : > { %1379 = vmatmul.mubr.bf16.vlgmr.msra.gmra.mxu0 %v2345_v33  ;;  %1536 = vmatmul.mubr.bf16.vlgmr.msra.gmra.mxu1 %v2345_v33 }
 0x10d   : > { %v440_v7 = vpop.f32.mrf.mxu0  ;;  %v595_v9 = vpop.f32.mrf.mxu1 }
 0x10e   : > { %v441_v8 = vadd.f32 %v440_v7, %v2557_v6  ;;  %v596_v10 = vadd.f32 %v595_v9, %v2557_v6 }
 0x10f   : > { %v442_v1 = vpop.f32.mrf.mxu0  ;;  %v597_v13 = vpop.f32.mrf.mxu1 }
 0x110   : > { %v447_v12 = vmax.f32 %v441_v8, 0.0  ;;  %v602_v0 = vmax.f32 %v596_v10, 0.0 }
 0x111   : > { %v443_v14 = vpop.f32.mrf.mxu0  ;;  %v598_v16 = vpop.f32.mrf.mxu1 }
 0x112   : > { %v444_v15 = vadd.f32 %v443_v14, %v2561_v11  ;;  %v604_v17 = vmax.f32 %v447_v12, %v602_v0  ;;  %v599_v33 = vadd.f32 %v598_v16, %v2561_v11 }
 0x113   : > { %v445_v18 = vpop.f32.mrf.mxu0  ;;  %v600_v20 = vpop.f32.mrf.mxu1 }
 0x114   : > { %v448_v19 = vmax.f32 %v444_v15, 0.0  ;;  %v603_v21 = vmax.f32 %v599_v33, 0.0  ;;  %v1558_v18 = vpop.permute.xlu1 %1557 }
 0x116   : > { %v605_v22 = vmax.f32 %v448_v19, %v603_v21 }
 0x145   : > { %v752_v23 = vpop.f32.mrf.mxu0  ;;  %v909_v25 = vpop.f32.mrf.mxu1 }
 0x146   : > { %v753_v24 = vadd.f32 %v752_v23, %v2557_v6  ;;  %v910_v26 = vadd.f32 %v909_v25, %v2557_v6 }
 0x147   : > { %v754_v27 = vpop.f32.mrf.mxu0  ;;  %v911_v29 = vpop.f32.mrf.mxu1 }
 0x148   : > { %v759_v28 = vmax.f32 %v753_v24, 0.0  ;;  %v916_v30 = vmax.f32 %v910_v26, 0.0 }
 0x149   : > { %v755_v31 = vpop.f32.mrf.mxu0  ;;  %v912_v35 = vpop.f32.mrf.mxu1 }
 0x14a   : > { %v761_v32 = vmax.f32 %v604_v17, %v759_v28  ;;  %v756_v34 = vadd.f32 %v755_v31, %v2561_v11  ;;  %v913_v36 = vadd.f32 %v912_v35, %v2561_v11 }
 0x14b   : > { %v757_v37 = vpop.f32.mrf.mxu0  ;;  %v914_v40 = vpop.f32.mrf.mxu1 }
 0x14c   : > { %v918_v38 = vmax.f32 %v761_v32, %v916_v30  ;;  %v760_v39 = vmax.f32 %v756_v34, 0.0  ;;  %v917_v42 = vmax.f32 %v913_v36, 0.0 }
 0x14e   : > { %v762_v41 = vmax.f32 %v605_v22, %v760_v39  ;;  %v1567_v22 = vpop.permute.xlu0 %1566 }
 0x150   : > { %v919_v43 = vmax.f32 %v762_v41, %v917_v42 }
 0x17d   : > { %v1066_v44 = vpop.f32.mrf.mxu0  ;;  %v1223_v45 = vpop.f32.mrf.mxu1 }
 0x17e   : > { %v1067_v52 = vadd.f32 %v1066_v44, %v2557_v6  ;;  %v1224_v54 = vadd.f32 %v1223_v45, %v2557_v6 }
 0x17f   : > { %v1068_v46 = vpop.f32.mrf.mxu0  ;;  %v1225_v47 = vpop.f32.mrf.mxu1 }
 0x180   : > { %v1073_v53 = vmax.f32 %v1067_v52, 0.0  ;;  %v1230_v57 = vmax.f32 %v1224_v54, 0.0 }
 0x181   : > { %v1069_v48 = vpop.f32.mrf.mxu0  ;;  %v1226_v49 = vpop.f32.mrf.mxu1 }
 0x182   : > { %v1070_v55 = vadd.f32 %v1069_v48, %v2561_v11  ;;  %v1075_v56 = vmax.f32 %v918_v38, %v1073_v53  ;;  %v1227_v60 = vadd.f32 %v1226_v49, %v2561_v11 }
 0x183   : > { %v1071_v50 = vpop.f32.mrf.mxu0  ;;  %v1228_v51 = vpop.f32.mrf.mxu1 }
 0x184   : > { %v1074_v58 = vmax.f32 %v1070_v55, 0.0  ;;  %v1232_v4 = vmax.f32 %v1075_v56, %v1230_v57  ;;  %v1231_v10 = vmax.f32 %v1227_v60, 0.0 }
 0x186   : > { %v1076_v5 = vmax.f32 %v919_v43, %v1074_v58 }
 0x188   : > { %v1233_v16 = vmax.f32 %v1076_v5, %v1231_v10 }
 0x1b5   : > { %v1380_v59 = vpop.f32.mrf.mxu0  ;;  %v1537_v62 = vpop.f32.mrf.mxu1 }
 0x1b6   : > { %v1381_v61 = vadd.f32 %v1380_v59, %v2557_v6  ;;  %v1538_v2 = vadd.f32 %v1537_v62, %v2557_v6 }
 0x1b7   : > { %v1382_v3 = vpop.f32.mrf.mxu0  ;;  %v1539_v8 = vpop.f32.mrf.mxu1 }
 0x1b8   : > { %v1387_v7 = vmax.f32 %v1381_v61, 0.0  ;;  %v1544_v12 = vmax.f32 %v1538_v2, 0.0 }
 0x1b9   : > { %v1383_v9 = vpop.f32.mrf.mxu0  ;;  %v1540_v0 = vpop.f32.mrf.mxu1 }
 0x1ba   : > { %v1389_v1 = vmax.f32 %v1232_v4, %v1387_v7  ;;  %v1384_v13 = vadd.f32 %v1383_v9, %v2561_v11  ;;  %v1541_v14 = vadd.f32 %v1540_v0, %v2561_v11  ;;  %v1572_v11 = vpop.permute.xlu1 %1571 }
 0x1bb   : > { %v1385_v15 = vpop.f32.mrf.mxu0  ;;  %v1542_v6 = vpop.f32.mrf.mxu1 }
 0x1bc   : > { %v1546_v17 = vmax.f32 %v1389_v1, %v1544_v12  ;;  %v1388_v33 = vmax.f32 %v1384_v13, 0.0  ;;  %v1545_v21 = vmax.f32 %v1541_v14, 0.0 }
 0x1be   : > { %v1560_v19 = vmul.f32 %v1553_v63, %v1546_v17  ;;  %v1390_v20 = vmax.f32 %v1233_v16, %v1388_v33 }
 0x1c0   : > { %v1574_v23 = vadd.f32 %v1567_v22, %v1560_v19  ;;  %v1547_v24 = vmax.f32 %v1390_v20, %v1545_v21 }
 0x1c2   : > { %v1561_v25 = vmul.f32 %v1558_v18, %v1547_v24  ;;  %1577 = vst.msk [vmem:[%s265_s12] sm:$0xff] %vm1576_vm2, %v1574_v23 }
 0x1c4   : > { %v1575_v26 = vadd.f32 %v1572_v11, %v1561_v25 }
 0x1c6   : > { %1578 = vst.msk [vmem:[%s265_s12 + $0x8] sm:$0xff] %vm1576_vm2, %v1575_v26 }
 0x1c7 PF: > { %s15_s22 = sadd.s32 1, %s2196_s22   ;;  %s2604_s18 = smov %s2188_s20 }
 0x1c8   : > { %p12_p8 = scmp.ge.s32.totalorder %s15_s22, 6   ;;  %s2605_s19 = smov %s2192_s21 }
 0x1c9   : > { %s2606_s20 = smov %s2609_s23  ;;  %s2607_s21 = smov %s2613_s24 }
 0x1ca   :  { %14 = sbr.rel (!%p12_p8) target bundleno = 3 (0x3), region = 77 }

// kernel: cnn3d3_forward.7
= control target key start
LH: loop header
LB: loop body
LE: loop exit
PB: predicated region body
PF: predicated region fallthrough
CT: control target
= control target key end

     0   :  { %v311_v1 = vmov 0.0   ;;  %vm312_vm0 = vmmov 0   ;;  %s407_s0 = inlined_call_operand.vmem [shape: f32[2,128], index: 0, kind: input, shape index: {}]   ;;  %s408_s1 = inlined_call_operand.vmem [shape: f32[128,128], index: 1, kind: input, shape index: {}]   ;;  %s409_s2 = inlined_call_operand.vmem [shape: f32[1,128], index: 2, kind: input, shape index: {}]   ;;  %s410_s3 = inlined_call_operand.vmem [shape: f32[3,128], index: 3, kind: input, shape index: {}]   ;;  %s411_s4 = inlined_call_operand.vmem [shape: f32[1,3], index: 4, kind: input, shape index: {}]   ;;  %s412_s5 = inlined_call_operand.hbm [shape: f32[2,3], index: 5, kind: output, shape index: {}]  }
   0x1   :  { %v43_v0 = vld [vmem:[%s408_s1 + $0x78] sm:$0xff]  ;;  %246 = vmatprep.subr.mxu0 %v311_v1  ;;  %25 = vst [vmem:[#allocation2] sm:$0x3] %v311_v1  ;;  %278 = vmatprep.mubr.msk.f32.mxu0 %vm312_vm0, %v311_v1  ;;  %v42_v2 = vld [vmem:[%s408_s1 + $0x70] sm:$0xff] }
   0x2   :  { %247 = vmatpush3.xpose.msra.mxu0 %v43_v0  ;;  %281 = vmatprep.subr.mxu1 %v311_v1 }
   0x3   :  { %248 = vmatprep.subr.mxu0 %v311_v1  ;;  %283 = vmatprep.mubr.msk.f32.mxu1 %vm312_vm0, %v311_v1 }
   0x4   :  { %10 = vsyncpa [#allocation4], 0  ;;  %v41_v3 = vld [vmem:[%s408_s1 + $0x68] sm:$0xff]  ;;  %v40_v4 = vld [vmem:[%s408_s1 + $0x60] sm:$0xff]  ;;  %vm209_vm2 = vcmask 17408  }
   0x5   :  { %v39_v5 = vld [vmem:[%s408_s1 + $0x58] sm:$0xff]  ;;  %v38_v6 = vld [vmem:[%s408_s1 + $0x50] sm:$0xff]  ;;  %v37_v7 = vld [vmem:[%s408_s1 + $0x48] sm:$0xff] }
   0x6   :  { %249 = vmatpush3.xpose.msra.mxu0 %v42_v2  ;;  %v36_v8 = vld [vmem:[%s408_s1 + $0x40] sm:$0xff]  ;;  %v35_v9 = vld [vmem:[%s408_s1 + $0x38] sm:$0xff]  ;;  %v34_v10 = vld [vmem:[%s408_s1 + $0x30] sm:$0xff] }
   0x7   :  { %250 = vmatprep.subr.mxu0 %v311_v1  ;;  %v33_v11 = vld [vmem:[%s408_s1 + $0x28] sm:$0xff]  ;;  %v32_v12 = vld [vmem:[%s408_s1 + $0x20] sm:$0xff]  ;;  %v31_v13 = vld [vmem:[%s408_s1 + $0x18] sm:$0xff] }
   0x8   :  { %v30_v14 = vld [vmem:[%s408_s1 + $0x10] sm:$0xff]  ;;  %v29_v15 = vld [vmem:[%s408_s1 + $0x8] sm:$0xff]  ;;  %v28_v16 = vld [vmem:[%s408_s1] sm:$0xff] }
   0x9   :  { %v27_v17 = vld [vmem:[%s407_s0] sm:$0x3] }
   0xa   :  { %251 = vmatpush3.xpose.msra.mxu0 %v41_v3  ;;  %v131_v18 = vld [vmem:[%s410_s3] sm:$0x7]  ;;  %s313_s3 = smov [#allocation3]  }
   0xb   :  { %252 = vmatprep.subr.mxu0 %v311_v1  ;;  %282 = vmatpush3.xpose.msra.mxu1 %v131_v18  ;;  %v26_v19 = vld [vmem:[#allocation2] sm:$0x3]  ;;  %s217_s6 = sshll.u32 %s313_s3, 4  ;;  %s218_s6 = int_to_ptr.vmem [resolvable:$true] %s217_s6 }
   0xc   :  { %v225_v23 = vld [vmem:[%s409_s2] ss:$0 sm:$0xff]  ;;  %s289_s7 = scalar_lea.vmem %s218_s6, 32  ;;  %p294_p1 = scmp.lt.s32.totalorder %s218_s6, %s218_s6 }
   0xd   :  { %v226_v28 = vld [vmem:[%s411_s4] ss:$0 sm:$0xff]  ;;  %p290_p0 = scmp.ne.s32.totalorder %s218_s6, %s289_s7  ;;  %p295_p2 = scmp.lt.s32.totalorder %s289_s7, %s289_s7 }
   0xe   :  { %253 = vmatpush3.xpose.msra.mxu0 %v40_v4 }
   0xf   :  { %254 = vmatprep.subr.mxu0 %v311_v1  ;;  %p296_p3 = por %p295_p2, %p294_p1 }
  0x11   :  { %p297_p4 = pnand %p296_p3, %p290_p0 }
  0x12   :  { %255 = vmatpush3.xpose.msra.mxu0 %v39_v5 }
  0x13   :  { %256 = vmatprep.subr.mxu0 %v311_v1 }
  0x16   :  { %257 = vmatpush3.xpose.msra.mxu0 %v38_v6 }
  0x17   :  { %258 = vmatprep.subr.mxu0 %v311_v1 }
  0x1a   :  { %259 = vmatpush3.xpose.msra.mxu0 %v37_v7 }
  0x1b   :  { %260 = vmatprep.subr.mxu0 %v311_v1 }
  0x1e   :  { %261 = vmatpush3.xpose.msra.mxu0 %v36_v8 }
  0x1f   :  { %262 = vmatprep.subr.mxu0 %v311_v1 }
  0x22   :  { %263 = vmatpush3.xpose.msra.mxu0 %v35_v9 }
  0x23   :  { %264 = vmatprep.subr.mxu0 %v311_v1 }
  0x26   :  { %265 = vmatpush3.xpose.msra.mxu0 %v34_v10 }
  0x27   :  { %266 = vmatprep.subr.mxu0 %v311_v1 }
  0x2a   :  { %267 = vmatpush3.xpose.msra.mxu0 %v33_v11 }
  0x2b   :  { %268 = vmatprep.subr.mxu0 %v311_v1 }
  0x2e   :  { %269 = vmatpush3.xpose.msra.mxu0 %v32_v12 }
  0x2f   :  { %270 = vmatprep.subr.mxu0 %v311_v1 }
  0x32   :  { %271 = vmatpush3.xpose.msra.mxu0 %v31_v13 }
  0x33   :  { %272 = vmatprep.subr.mxu0 %v311_v1 }
  0x36   :  { %273 = vmatpush3.xpose.msra.mxu0 %v30_v14 }
  0x37   :  { %274 = vmatprep.subr.mxu0 %v311_v1 }
  0x3a   :  { %275 = vmatpush3.xpose.msra.mxu0 %v29_v15 }
  0x3b   :  { %276 = vmatprep.subr.mxu0 %v311_v1 }
  0x3e   :  { %277 = vmatpush3.xpose.msra.mxu0 %v28_v16 }
  0x41   :  { %279 = vmatmul.mubr.f32.vlgmr.msra.gmra.mxu0 %v27_v17 }
 0x101   :  { %v110_v20 = vpop.f32.mrf.mxu0 }
 0x102   :  { %v114_v21 = vadd.f32 %v110_v20, %v26_v19 }
 0x103   :  { %v280_v22 = vpop.f32.mrf.mxu0 }
 0x104   :  { %115 = vst [vmem:[#allocation2] sm:$0x3] %v114_v21 }
 0x10b   :  { %v119_v24 = vld [vmem:[#allocation2] sm:$0x3] }
 0x10c   :  { %v127_v25 = vadd.f32 %v225_v23, %v119_v24 }
 0x10e   :  { %vm128_vm1 = vcmp.ge.f32.partialorder %v127_v25, 0.0  ;;  %v129_v26 = vmul.f32 0.01, %v127_v25 }
 0x110   :  { %v130_v27 = vsel %vm128_vm1, %v127_v25, %v129_v26 }
 0x111   :  { %284 = vmatmul.mubr.f32.vlgmr.msra.gmra.mxu1 %v130_v27 }
 0x1d1   :  { %v205_v29 = vpop.f32.mrf.mxu1 }
 0x1d2   :  { %v206_v30 = vadd.f32 %v226_v28, %v205_v29 }
 0x1d3   :  { %v285_v31 = vpop.f32.mrf.mxu1 }
 0x1d4   :  { %210 = vst.msk [vmem:[#allocation3] sm:$0x3] %vm209_vm2, %v206_v30 }
 0x1d5   :  { %300 = shalt.err (!%p297_p4)
}
 0x1d6   :  { %220 = dma.vmem_to_hbm [thread:$0]  %s218_s6, 32, %s412_s5, [#allocation4]  }
 0x1d7   :  { %309 = dma.done.wait [#allocation4], 32  }
 0x1d8   :  { %310 = vsyncadd [#allocation4], 4294967264 }
 0x1d9   :  { %224 = vsyncpa [#allocation4], 1 }

</bundles_post_ra>
